<compile_context>
chip_gen: v7x
topology: tpu7x:2x2x1
jax: 0.10.0
libtpu: 0.0.40
codegen_flags: <defaults>
</compile_context>

<pallas_src>
import jax
import jax.numpy as jnp
from jax.experimental import pallas as pl
from jax.experimental.pallas import tpu as pltpu

V_JOINTS = 13
LANES = 256          # slab lane width (max channel count in the network)
ROW_PAD = 16         # bf16 packs 2 rows/sublane -> keep every piece 16-row aligned


# ----------------------------------------------------------------------------
# Host-side slab packing.
# ----------------------------------------------------------------------------
def pack_slab(entries):
    """Pack a list of 2-D arrays into one (R, LANES) bf16 slab.

    Returns (slab, layout) where layout[k] = (row_offset, rows, cols) of entry k.
    Row offsets are multiples of ROW_PAD; columns always start at lane 0.
    """
    layout = []
    total = 0
    for a in entries:
        r, c = a.shape
        assert c <= LANES, f"entry wider than slab: {a.shape}"
        layout.append((total, r, c))
        total += ((r + ROW_PAD - 1) // ROW_PAD) * ROW_PAD
    slab = jnp.zeros((total, LANES), jnp.bfloat16)
    for (off, r, c), a in zip(layout, entries):
        slab = slab.at[off:off + r, :c].set(a.astype(jnp.bfloat16))
    return slab, tuple(layout)


# ----------------------------------------------------------------------------
# Fused Pallas kernel: 9 blocks + pool + FC in one shot.
# ----------------------------------------------------------------------------
def make_fused_kernel(layout, use_res_flags):
    """layout: packing layout of the slab; use_res_flags: per-block residual-conv flag."""

    def kernel(x_ref, slab_ref, o_ref):
        it = iter(layout)

        def take():
            off, r, c = next(it)
            return slab_ref[off:off + r, :c]           # static, tile-friendly view (bf16)

        def bf(v):
            return v.astype(jnp.bfloat16)

        def mm(p, w):                                  # bf16 x bf16 -> f32 MXU matmul
            return jnp.dot(bf(p), w, preferred_element_type=jnp.float32)

        a = take()                                     # (M, M) block-diag normalized A
        h = x_ref[...]                                 # (M, Cin) f32 activations

        for use_res in use_res_flags:
            ws, bs, wt, bt = take(), take(), take(), take()
            if use_res:
                wr, br = take(), take()
                res = mm(h, wr) + br                   # 1x1 residual conv
            else:
                res = h
            # SpatialGCN: graph mixing + 1x1 conv (+ folded BN) + ReLU
            z = jnp.dot(a, bf(h), preferred_element_type=jnp.float32)
            y = jnp.maximum(mm(z, ws) + bs, 0.0)
            # TemporalGCN (T == 1, all 6 branches + conv2 + BN folded) + ReLU
            t = jnp.maximum(mm(y, wt) + bt, 0.0)
            h = t + res

        # Head: AdaptiveAvgPool over (T=1, V) via tiny pooling matrix, then Linear.
        pool, wfc, bfc = take(), take(), take()
        pooled = jnp.dot(pool, bf(h), preferred_element_type=jnp.float32)   # (N, 256)
        o_ref[...] = mm(pooled, wfc) + bfc                                   # (N, NC_pad)

    return kernel


def stgcn_forward_fused(x, fq, *, num_classes):
    """x: (N, V, Cin) channels-last with T (==1) squeezed. fq: bf16 inference params."""
    N, V, cin = x.shape
    nc_pad = fq["wfc"].shape[1]
    M = N * V
    x2 = x.reshape(M, cin).astype(jnp.float32)

    # Pack every parameter (adjacency, per-block weights, pool matrix, FC) into ONE slab.
    entries = [fq["a_block"]]
    use_res = []
    for bp in fq["blocks"]:
        use_res.append("wr" in bp)
        entries += [bp["ws"], bp["bs"], bp["wt"], bp["bt"]]
        if "wr" in bp:
            entries += [bp["wr"], bp["br"]]
    entries += [fq["pool"], fq["wfc"], fq["bfc"]]
    slab, layout = pack_slab(entries)

    out = pl.pallas_call(
        make_fused_kernel(layout, tuple(use_res)),
        out_shape=jax.ShapeDtypeStruct((N, nc_pad), jnp.float32),
        grid_spec=pltpu.PrefetchScalarGridSpec(
            num_scalar_prefetch=0,
            grid=(1,),
            in_specs=[
                pl.BlockSpec(x2.shape, lambda i: (0, 0)),
                pl.BlockSpec(slab.shape, lambda i: (0, 0)),
            ],
            out_specs=pl.BlockSpec((N, nc_pad), lambda i: (0, 0)),
        ),
        compiler_params=pltpu.CompilerParams(dimension_semantics=("arbitrary",)),
    )(x2, slab)

    return out[:, :num_classes]


# ----------------------------------------------------------------------------
# Parameter init (PyTorch-style raw params) and host-side folding.
# ----------------------------------------------------------------------------
_CFG = [(3, 64), (64, 64), (64, 64), (64, 128), (128, 128), (128, 128),
        (128, 256), (256, 256), (256, 256)]


def init_raw_params(key, num_classes=60):
    cnt = [0]

    def rnd(shape, scale=0.1, base=0.0):
        cnt[0] += 1
        return base + scale * jax.random.normal(
            jax.random.fold_in(key, cnt[0]), shape, jnp.float32)

    def runif(shape, lo, hi):
        cnt[0] += 1
        return jax.random.uniform(jax.random.fold_in(key, cnt[0]), shape,
                                  jnp.float32, lo, hi)

    blocks = []
    for cin, cout in _CFG:
        c6 = cout // 6
        b = dict(
            cin=cin, cout=cout, c6=c6,
            s_w=rnd((cout, cin)), s_b=rnd((cout,)),
            s_gamma=rnd((cout,), 0.05, 1.0), s_beta=rnd((cout,)),
            s_mean=rnd((cout,)), s_var=runif((cout,), 0.5, 1.5),
            w1=rnd((c6, cout)), b1=rnd((c6,)),
            wb0=rnd((c6, c6)), bb0=rnd((c6,)),
            wd=rnd((4, c6, c6, 3, 1)), bd=rnd((4, c6)),
            w2=rnd((cout, 6 * c6)), b2=rnd((cout,)),     # see conv2 TODO(synk) at top
            t_gamma=rnd((cout,), 0.05, 1.0), t_beta=rnd((cout,)),
            t_mean=rnd((cout,)), t_var=runif((cout,), 0.5, 1.5),
        )
        if cin != cout:
            b["r_w"] = rnd((cout, cin))
            b["r_b"] = rnd((cout,))
        blocks.append(b)
    wfc = rnd((num_classes, 256))
    bfc = rnd((num_classes,))
    return blocks, wfc, bfc


def fold_params(raw_blocks, wfc, bfc, num_classes, eps=1e-5):
    """Fold conv+BN (spatial) and conv1+branches+conv2+BN (temporal, T==1) per block."""
    nc_pad = ((num_classes + 127) // 128) * 128
    blocks = []
    for b in raw_blocks:
        cout, c6 = b["cout"], b["c6"]

        # SpatialGCN conv + BN -> (cin, cout) weight, (1, cout) bias
        s_scale = b["s_gamma"] / jnp.sqrt(b["s_var"] + eps)
        ws = b["s_w"].T * s_scale[None, :]
        bs = ((b["s_b"] - b["s_mean"]) * s_scale + b["s_beta"])[None, :]

        # TemporalGCN: conv1 + 6 branches + conv2 + BN -> (cout, cout) / (1, cout)
        t_scale = b["t_gamma"] / jnp.sqrt(b["t_var"] + eps)
        w2 = b["w2"].T * t_scale[None, :]                            # (6*c6, cout)
        b2 = ((b["b2"] - b["t_mean"]) * t_scale + b["t_beta"])[None, :]
        w2b = w2.reshape(6, c6, cout)
        wb0 = b["wb0"].T                                             # (c6_in, c6_out)
        wd = jnp.transpose(b["wd"][:, :, :, 1, 0], (0, 2, 1))        # center taps

        m = wb0 @ w2b[0] + w2b[1]                                    # (c6, cout)
        c = b["bb0"][None, :] @ w2b[0] + b2                          # (1, cout)
        for i in range(4):
            m = m + wd[i] @ w2b[2 + i]
            c = c + b["bd"][i][None, :] @ w2b[2 + i]
        w1 = b["w1"].T                                               # (cout, c6)
        wt = w1 @ m                                                  # (cout, cout)
        bt = b["b1"][None, :] @ m + c                                # (1, cout)

        fb = dict(ws=ws, bs=bs, wt=wt, bt=bt)
        if "r_w" in b:
            fb["wr"] = b["r_w"].T
            fb["br"] = b["r_b"][None, :]
        blocks.append(fb)

    wfc_pad = jnp.zeros((256, nc_pad), jnp.float32).at[:, :num_classes].set(wfc.T)
    bfc_pad = jnp.zeros((1, nc_pad), jnp.float32).at[0, :num_classes].set(bfc)
    return dict(blocks=blocks, wfc=wfc_pad, bfc=bfc_pad)


def build_inference_params(a_norm, folded, batch, v):
    """Attach the block-diagonal adjacency + pooling matrix; return (f32, bf16) dicts."""
    eye = jnp.eye(batch, dtype=jnp.float32)
    a_block = jnp.kron(eye, a_norm)                                  # (batch*V, batch*V)
    pool = jnp.kron(eye, jnp.full((1, v), 1.0 / v, jnp.float32))     # (batch, batch*V)
    fp32 = dict(a_block=a_block, pool=pool, blocks=folded["blocks"],
                wfc=folded["wfc"], bfc=folded["bfc"])
    fq = jax.tree_util.tree_map(lambda w: w.astype(jnp.bfloat16), fp32)
    return fp32, fq


# ----------------------------------------------------------------------------
# Pure-JAX references.
# ----------------------------------------------------------------------------
def reference_forward(x, a_norm, raw_blocks, wfc, bfc, eps=1e-5):
    """Unfolded f32 reference with the PyTorch module's T == 1 semantics."""
    h = x                                                            # (N, V, C)
    for b in raw_blocks:
        s_scale = b["s_gamma"] / jnp.sqrt(b["s_var"] + eps)
        t_scale = b["t_gamma"] / jnp.sqrt(b["t_var"] + eps)
        if "r_w" in b:
            res = jnp.einsum('nvc,oc->nvo', h, b["r_w"]) + b["r_b"]
        else:
            res = h
        z = jnp.einsum('vw,nwc->nvc', a_norm, h)
        y = jnp.einsum('nvc,oc->nvo', z, b["s_w"]) + b["s_b"]
        y = jax.nn.relu((y - b["s_mean"]) * s_scale + b["s_beta"])
        x1 = jnp.einsum('nvc,oc->nvo', y, b["w1"]) + b["b1"]
        outs = [jnp.einsum('nvc,oc->nvo', x1, b["wb0"]) + b["bb0"], x1]   # conv / maxpool(=id)
        for i in range(4):                                                # dilated center taps
            outs.append(jnp.einsum('nvc,oc->nvo', x1, b["wd"][i, :, :, 1, 0]) + b["bd"][i])
        cat = jnp.concatenate(outs, axis=-1)
        t = jnp.einsum('nvc,oc->nvo', cat, b["w2"]) + b["b2"]
        t = jax.nn.relu((t - b["t_mean"]) * t_scale + b["t_beta"])
        h = t + res
    pooled = h.mean(axis=1)
    return pooled @ wfc.T + bfc


def folded_reference(x2, fp, op_dtype):
    """Folded-model reference mirroring the kernel's op order and dot operand dtype."""
    cast = lambda v: v.astype(op_dtype)

    def mm(p, w):
        return jnp.dot(cast(p), cast(w), preferred_element_type=jnp.float32)

    a = fp["a_block"]
    h = x2.astype(jnp.float32)
    for bp in fp["blocks"]:
        res = (mm(h, bp["wr"]) + bp["br"]) if "wr" in bp else h
        z = mm(a, h)
        y = jnp.maximum(mm(z, bp["ws"]) + bp["bs"], 0.0)
        t = jnp.maximum(mm(y, bp["wt"]) + bp["bt"], 0.0)
        h = t + res
    pooled = mm(fp["pool"], h)
    return mm(pooled, fp["wfc"]) + fp["bfc"]


def _rel_err(a, b):
    return float(jnp.max(jnp.abs(a - b)) / (jnp.max(jnp.abs(b)) + 1e-6))


# ----------------------------------------------------------------------------
if __name__ == "__main__":
    key = jax.random.PRNGKey(0)
    N, T, V, C = 2, 1, V_JOINTS, 3
    num_classes = 60
    # TODO(synk): T must equal 1 — MaxPool2d((3,1)) uses stride==kernel, so the branch
    # outputs only concatenate consistently at T == 1 (same constraint as the PyTorch code).
    x_in = jax.random.normal(jax.random.fold_in(key, 999), (N, T, V, C), jnp.float32)

    raw_blocks, wfc_raw, bfc_raw = init_raw_params(jax.random.fold_in(key, 1), num_classes)
    folded = fold_params(raw_blocks, wfc_raw, bfc_raw, num_classes)

    # Normalized adjacency: A_hat = A + I; D = diag(rowsum)^(-1/2); A_norm = D A_hat D
    A = jnp.ones((V, V), jnp.float32)                    # default A in STGCNPlusPlus
    A_hat = A + jnp.eye(V, dtype=jnp.float32)
    d = 1.0 / jnp.sqrt(A_hat.sum(axis=1))
    a_norm = d[:, None] * A_hat * d[None, :]

    x = x_in[:, 0, :, :]                                 # (N, V, 3) channels-last, T squeezed
    fp32, fq = build_inference_params(a_norm, folded, N, V)

    # --- run the fused Pallas kernel -----------------------------------------------------
    logits = stgcn_forward_fused(x, fq, num_classes=num_classes)
    jax.block_until_ready(logits)
    assert logits.shape == (N, num_classes) and logits.dtype == jnp.float32

    # --- correctness check 1: constant-folding is exact in f32 ---------------------------
    ref_raw = reference_forward(x, a_norm, raw_blocks, wfc_raw, bfc_raw)
    x2 = x.reshape(N * V, C)
    ref_fold_f32 = folded_reference(x2, fp32, jnp.float32)[:, :num_classes]
    err_fold = _rel_err(ref_fold_f32, ref_raw)
    assert err_fold < 1e-3, f"folding mismatch vs raw f32 reference: rel err {err_fold}"

    # --- correctness check 2: kernel matches the bf16-quantized folded model -------------
    ref_fold_bf16 = folded_reference(x2, fq, jnp.bfloat16)[:, :num_classes]
    err_kernel = _rel_err(logits, ref_fold_bf16)
    assert err_kernel < 1e-3, f"kernel mismatch vs bf16 folded reference: rel err {err_kernel}"

    print("KERNEL_OK")
</pallas_src>

<mosaic_0001>
module attributes {stable_mosaic.version = 11 : i64} {
  func.func @kernel(%arg0: i32, %arg1: memref<26x3xf32, #tpu.memory_space<vmem>>, %arg2: memref<3312x256xbf16, #tpu.memory_space<vmem>>, %arg3: memref<2x128xf32, #tpu.memory_space<vmem>>) attributes {dimension_semantics = [#tpu.dimension_semantics<arbitrary>], iteration_bounds = array<i64: 1>, scalar_prefetch = 0 : i64, scratch_operands = 0 : i64, tpu.core_type = #tpu.core_type<tc>, window_params = [{pipeline_mode = #tpu.pipeline_mode<synchronous>, transform_indices = @transform_0, window_bounds = array<i64: 26, 3>}, {pipeline_mode = #tpu.pipeline_mode<synchronous>, transform_indices = @transform_1, window_bounds = array<i64: 3312, 256>}, {pipeline_mode = #tpu.pipeline_mode<synchronous>, transform_indices = @transform_2, window_bounds = array<i64: 2, 128>}]} {
    %c0 = arith.constant 0 : index
    %c0_0 = arith.constant 0 : index
    %0 = vector.load %arg2[%c0, %c0_0] : memref<3312x256xbf16, #tpu.memory_space<vmem>>, vector<26x26xbf16>
    %c0_1 = arith.constant 0 : index
    %c0_2 = arith.constant 0 : index
    %1 = vector.load %arg1[%c0_1, %c0_2] : memref<26x3xf32, #tpu.memory_space<vmem>>, vector<26x3xf32>
    %c32 = arith.constant 32 : index
    %c0_3 = arith.constant 0 : index
    %2 = vector.load %arg2[%c32, %c0_3] : memref<3312x256xbf16, #tpu.memory_space<vmem>>, vector<3x64xbf16>
    %c48 = arith.constant 48 : index
    %c0_4 = arith.constant 0 : index
    %3 = vector.load %arg2[%c48, %c0_4] : memref<3312x256xbf16, #tpu.memory_space<vmem>>, vector<1x64xbf16>
    %c64 = arith.constant 64 : index
    %c0_5 = arith.constant 0 : index
    %4 = vector.load %arg2[%c64, %c0_5] : memref<3312x256xbf16, #tpu.memory_space<vmem>>, vector<64x64xbf16>
    %c128 = arith.constant 128 : index
    %c0_6 = arith.constant 0 : index
    %5 = vector.load %arg2[%c128, %c0_6] : memref<3312x256xbf16, #tpu.memory_space<vmem>>, vector<1x64xbf16>
    %c144 = arith.constant 144 : index
    %c0_7 = arith.constant 0 : index
    %6 = vector.load %arg2[%c144, %c0_7] : memref<3312x256xbf16, #tpu.memory_space<vmem>>, vector<3x64xbf16>
    %c160 = arith.constant 160 : index
    %c0_8 = arith.constant 0 : index
    %7 = vector.load %arg2[%c160, %c0_8] : memref<3312x256xbf16, #tpu.memory_space<vmem>>, vector<1x64xbf16>
    %8 = arith.truncf %1 : vector<26x3xf32> to vector<26x3xbf16>
    %cst = arith.constant dense<0.000000e+00> : vector<26x64xf32>
    %9 = tpu.matmul %8, %6, %cst {dimension_numbers = #tpu.dot_dimension_numbers<[1], [0], [0], [1], [0, 0, 1, 1], [], []>} : vector<26x3xbf16>, vector<3x64xbf16>, vector<26x64xf32> -> vector<26x64xf32>
    %10 = arith.extf %7 : vector<1x64xbf16> to vector<1x64xf32>
    %11 = vector.broadcast %10 : vector<1x64xf32> to vector<26x64xf32>
    %12 = arith.addf %9, %11 : vector<26x64xf32>
    %13 = arith.truncf %1 : vector<26x3xf32> to vector<26x3xbf16>
    %cst_9 = arith.constant dense<0.000000e+00> : vector<26x3xf32>
    %14 = tpu.matmul %0, %13, %cst_9 {dimension_numbers = #tpu.dot_dimension_numbers<[1], [0], [0], [1], [0, 0, 1, 1], [], []>} : vector<26x26xbf16>, vector<26x3xbf16>, vector<26x3xf32> -> vector<26x3xf32>
    %15 = arith.truncf %14 : vector<26x3xf32> to vector<26x3xbf16>
    %cst_10 = arith.constant dense<0.000000e+00> : vector<26x64xf32>
    %16 = tpu.matmul %15, %2, %cst_10 {dimension_numbers = #tpu.dot_dimension_numbers<[1], [0], [0], [1], [0, 0, 1, 1], [], []>} : vector<26x3xbf16>, vector<3x64xbf16>, vector<26x64xf32> -> vector<26x64xf32>
    %17 = arith.extf %3 : vector<1x64xbf16> to vector<1x64xf32>
    %18 = vector.broadcast %17 : vector<1x64xf32> to vector<26x64xf32>
    %19 = arith.addf %16, %18 : vector<26x64xf32>
    %cst_11 = arith.constant 0.000000e+00 : f32
    %20 = vector.broadcast %cst_11 : f32 to vector<26x64xf32>
    %21 = arith.maximumf %19, %20 : vector<26x64xf32>
    %22 = arith.truncf %21 : vector<26x64xf32> to vector<26x64xbf16>
    %cst_12 = arith.constant dense<0.000000e+00> : vector<26x64xf32>
    %23 = tpu.matmul %22, %4, %cst_12 {dimension_numbers = #tpu.dot_dimension_numbers<[1], [0], [0], [1], [0, 0, 1, 1], [], []>} : vector<26x64xbf16>, vector<64x64xbf16>, vector<26x64xf32> -> vector<26x64xf32>
    %24 = arith.extf %5 : vector<1x64xbf16> to vector<1x64xf32>
    %25 = vector.broadcast %24 : vector<1x64xf32> to vector<26x64xf32>
    %26 = arith.addf %23, %25 : vector<26x64xf32>
    %cst_13 = arith.constant 0.000000e+00 : f32
    %27 = vector.broadcast %cst_13 : f32 to vector<26x64xf32>
    %28 = arith.maximumf %26, %27 : vector<26x64xf32>
    %29 = arith.addf %28, %12 : vector<26x64xf32>
    %c176 = arith.constant 176 : index
    %c0_14 = arith.constant 0 : index
    %30 = vector.load %arg2[%c176, %c0_14] : memref<3312x256xbf16, #tpu.memory_space<vmem>>, vector<64x64xbf16>
    %c240 = arith.constant 240 : index
    %c0_15 = arith.constant 0 : index
    %31 = vector.load %arg2[%c240, %c0_15] : memref<3312x256xbf16, #tpu.memory_space<vmem>>, vector<1x64xbf16>
    %c256 = arith.constant 256 : index
    %c0_16 = arith.constant 0 : index
    %32 = vector.load %arg2[%c256, %c0_16] : memref<3312x256xbf16, #tpu.memory_space<vmem>>, vector<64x64xbf16>
    %c320 = arith.constant 320 : index
    %c0_17 = arith.constant 0 : index
    %33 = vector.load %arg2[%c320, %c0_17] : memref<3312x256xbf16, #tpu.memory_space<vmem>>, vector<1x64xbf16>
    %34 = arith.truncf %29 : vector<26x64xf32> to vector<26x64xbf16>
    %cst_18 = arith.constant dense<0.000000e+00> : vector<26x64xf32>
    %35 = tpu.matmul %0, %34, %cst_18 {dimension_numbers = #tpu.dot_dimension_numbers<[1], [0], [0], [1], [0, 0, 1, 1], [], []>} : vector<26x26xbf16>, vector<26x64xbf16>, vector<26x64xf32> -> vector<26x64xf32>
    %36 = arith.truncf %35 : vector<26x64xf32> to vector<26x64xbf16>
    %cst_19 = arith.constant dense<0.000000e+00> : vector<26x64xf32>
    %37 = tpu.matmul %36, %30, %cst_19 {dimension_numbers = #tpu.dot_dimension_numbers<[1], [0], [0], [1], [0, 0, 1, 1], [], []>} : vector<26x64xbf16>, vector<64x64xbf16>, vector<26x64xf32> -> vector<26x64xf32>
    %38 = arith.extf %31 : vector<1x64xbf16> to vector<1x64xf32>
    %39 = vector.broadcast %38 : vector<1x64xf32> to vector<26x64xf32>
    %40 = arith.addf %37, %39 : vector<26x64xf32>
    %cst_20 = arith.constant 0.000000e+00 : f32
    %41 = vector.broadcast %cst_20 : f32 to vector<26x64xf32>
    %42 = arith.maximumf %40, %41 : vector<26x64xf32>
    %43 = arith.truncf %42 : vector<26x64xf32> to vector<26x64xbf16>
    %cst_21 = arith.constant dense<0.000000e+00> : vector<26x64xf32>
    %44 = tpu.matmul %43, %32, %cst_21 {dimension_numbers = #tpu.dot_dimension_numbers<[1], [0], [0], [1], [0, 0, 1, 1], [], []>} : vector<26x64xbf16>, vector<64x64xbf16>, vector<26x64xf32> -> vector<26x64xf32>
    %45 = arith.extf %33 : vector<1x64xbf16> to vector<1x64xf32>
    %46 = vector.broadcast %45 : vector<1x64xf32> to vector<26x64xf32>
    %47 = arith.addf %44, %46 : vector<26x64xf32>
    %cst_22 = arith.constant 0.000000e+00 : f32
    %48 = vector.broadcast %cst_22 : f32 to vector<26x64xf32>
    %49 = arith.maximumf %47, %48 : vector<26x64xf32>
    %50 = arith.addf %49, %29 : vector<26x64xf32>
    %c336 = arith.constant 336 : index
    %c0_23 = arith.constant 0 : index
    %51 = vector.load %arg2[%c336, %c0_23] : memref<3312x256xbf16, #tpu.memory_space<vmem>>, vector<64x64xbf16>
    %c400 = arith.constant 400 : index
    %c0_24 = arith.constant 0 : index
    %52 = vector.load %arg2[%c400, %c0_24] : memref<3312x256xbf16, #tpu.memory_space<vmem>>, vector<1x64xbf16>
    %c416 = arith.constant 416 : index
    %c0_25 = arith.constant 0 : index
    %53 = vector.load %arg2[%c416, %c0_25] : memref<3312x256xbf16, #tpu.memory_space<vmem>>, vector<64x64xbf16>
    %c480 = arith.constant 480 : index
    %c0_26 = arith.constant 0 : index
    %54 = vector.load %arg2[%c480, %c0_26] : memref<3312x256xbf16, #tpu.memory_space<vmem>>, vector<1x64xbf16>
    %55 = arith.truncf %50 : vector<26x64xf32> to vector<26x64xbf16>
    %cst_27 = arith.constant dense<0.000000e+00> : vector<26x64xf32>
    %56 = tpu.matmul %0, %55, %cst_27 {dimension_numbers = #tpu.dot_dimension_numbers<[1], [0], [0], [1], [0, 0, 1, 1], [], []>} : vector<26x26xbf16>, vector<26x64xbf16>, vector<26x64xf32> -> vector<26x64xf32>
    %57 = arith.truncf %56 : vector<26x64xf32> to vector<26x64xbf16>
    %cst_28 = arith.constant dense<0.000000e+00> : vector<26x64xf32>
    %58 = tpu.matmul %57, %51, %cst_28 {dimension_numbers = #tpu.dot_dimension_numbers<[1], [0], [0], [1], [0, 0, 1, 1], [], []>} : vector<26x64xbf16>, vector<64x64xbf16>, vector<26x64xf32> -> vector<26x64xf32>
    %59 = arith.extf %52 : vector<1x64xbf16> to vector<1x64xf32>
    %60 = vector.broadcast %59 : vector<1x64xf32> to vector<26x64xf32>
    %61 = arith.addf %58, %60 : vector<26x64xf32>
    %cst_29 = arith.constant 0.000000e+00 : f32
    %62 = vector.broadcast %cst_29 : f32 to vector<26x64xf32>
    %63 = arith.maximumf %61, %62 : vector<26x64xf32>
    %64 = arith.truncf %63 : vector<26x64xf32> to vector<26x64xbf16>
    %cst_30 = arith.constant dense<0.000000e+00> : vector<26x64xf32>
    %65 = tpu.matmul %64, %53, %cst_30 {dimension_numbers = #tpu.dot_dimension_numbers<[1], [0], [0], [1], [0, 0, 1, 1], [], []>} : vector<26x64xbf16>, vector<64x64xbf16>, vector<26x64xf32> -> vector<26x64xf32>
    %66 = arith.extf %54 : vector<1x64xbf16> to vector<1x64xf32>
    %67 = vector.broadcast %66 : vector<1x64xf32> to vector<26x64xf32>
    %68 = arith.addf %65, %67 : vector<26x64xf32>
    %cst_31 = arith.constant 0.000000e+00 : f32
    %69 = vector.broadcast %cst_31 : f32 to vector<26x64xf32>
    %70 = arith.maximumf %68, %69 : vector<26x64xf32>
    %71 = arith.addf %70, %50 : vector<26x64xf32>
    %c496 = arith.constant 496 : index
    %c0_32 = arith.constant 0 : index
    %72 = vector.load %arg2[%c496, %c0_32] : memref<3312x256xbf16, #tpu.memory_space<vmem>>, vector<64x128xbf16>
    %c560 = arith.constant 560 : index
    %c0_33 = arith.constant 0 : index
    %73 = vector.load %arg2[%c560, %c0_33] : memref<3312x256xbf16, #tpu.memory_space<vmem>>, vector<1x128xbf16>
    %c576 = arith.constant 576 : index
    %c0_34 = arith.constant 0 : index
    %74 = vector.load %arg2[%c576, %c0_34] : memref<3312x256xbf16, #tpu.memory_space<vmem>>, vector<128x128xbf16>
    %c704 = arith.constant 704 : index
    %c0_35 = arith.constant 0 : index
    %75 = vector.load %arg2[%c704, %c0_35] : memref<3312x256xbf16, #tpu.memory_space<vmem>>, vector<1x128xbf16>
    %c720 = arith.constant 720 : index
    %c0_36 = arith.constant 0 : index
    %76 = vector.load %arg2[%c720, %c0_36] : memref<3312x256xbf16, #tpu.memory_space<vmem>>, vector<64x128xbf16>
    %c784 = arith.constant 784 : index
    %c0_37 = arith.constant 0 : index
    %77 = vector.load %arg2[%c784, %c0_37] : memref<3312x256xbf16, #tpu.memory_space<vmem>>, vector<1x128xbf16>
    %78 = arith.truncf %71 : vector<26x64xf32> to vector<26x64xbf16>
    %cst_38 = arith.constant dense<0.000000e+00> : vector<26x128xf32>
    %79 = tpu.matmul %78, %76, %cst_38 {dimension_numbers = #tpu.dot_dimension_numbers<[1], [0], [0], [1], [0, 0, 1, 1], [], []>} : vector<26x64xbf16>, vector<64x128xbf16>, vector<26x128xf32> -> vector<26x128xf32>
    %80 = arith.extf %77 : vector<1x128xbf16> to vector<1x128xf32>
    %81 = vector.broadcast %80 : vector<1x128xf32> to vector<26x128xf32>
    %82 = arith.addf %79, %81 : vector<26x128xf32>
    %83 = arith.truncf %71 : vector<26x64xf32> to vector<26x64xbf16>
    %cst_39 = arith.constant dense<0.000000e+00> : vector<26x64xf32>
    %84 = tpu.matmul %0, %83, %cst_39 {dimension_numbers = #tpu.dot_dimension_numbers<[1], [0], [0], [1], [0, 0, 1, 1], [], []>} : vector<26x26xbf16>, vector<26x64xbf16>, vector<26x64xf32> -> vector<26x64xf32>
    %85 = arith.truncf %84 : vector<26x64xf32> to vector<26x64xbf16>
    %cst_40 = arith.constant dense<0.000000e+00> : vector<26x128xf32>
    %86 = tpu.matmul %85, %72, %cst_40 {dimension_numbers = #tpu.dot_dimension_numbers<[1], [0], [0], [1], [0, 0, 1, 1], [], []>} : vector<26x64xbf16>, vector<64x128xbf16>, vector<26x128xf32> -> vector<26x128xf32>
    %87 = arith.extf %73 : vector<1x128xbf16> to vector<1x128xf32>
    %88 = vector.broadcast %87 : vector<1x128xf32> to vector<26x128xf32>
    %89 = arith.addf %86, %88 : vector<26x128xf32>
    %cst_41 = arith.constant 0.000000e+00 : f32
    %90 = vector.broadcast %cst_41 : f32 to vector<26x128xf32>
    %91 = arith.maximumf %89, %90 : vector<26x128xf32>
    %92 = arith.truncf %91 : vector<26x128xf32> to vector<26x128xbf16>
    %cst_42 = arith.constant dense<0.000000e+00> : vector<26x128xf32>
    %93 = tpu.matmul %92, %74, %cst_42 {dimension_numbers = #tpu.dot_dimension_numbers<[1], [0], [0], [1], [0, 0, 1, 1], [], []>} : vector<26x128xbf16>, vector<128x128xbf16>, vector<26x128xf32> -> vector<26x128xf32>
    %94 = arith.extf %75 : vector<1x128xbf16> to vector<1x128xf32>
    %95 = vector.broadcast %94 : vector<1x128xf32> to vector<26x128xf32>
    %96 = arith.addf %93, %95 : vector<26x128xf32>
    %cst_43 = arith.constant 0.000000e+00 : f32
    %97 = vector.broadcast %cst_43 : f32 to vector<26x128xf32>
    %98 = arith.maximumf %96, %97 : vector<26x128xf32>
    %99 = arith.addf %98, %82 : vector<26x128xf32>
    %c800 = arith.constant 800 : index
    %c0_44 = arith.constant 0 : index
    %100 = vector.load %arg2[%c800, %c0_44] : memref<3312x256xbf16, #tpu.memory_space<vmem>>, vector<128x128xbf16>
    %c928 = arith.constant 928 : index
    %c0_45 = arith.constant 0 : index
    %101 = vector.load %arg2[%c928, %c0_45] : memref<3312x256xbf16, #tpu.memory_space<vmem>>, vector<1x128xbf16>
    %c944 = arith.constant 944 : index
    %c0_46 = arith.constant 0 : index
    %102 = vector.load %arg2[%c944, %c0_46] : memref<3312x256xbf16, #tpu.memory_space<vmem>>, vector<128x128xbf16>
    %c1072 = arith.constant 1072 : index
    %c0_47 = arith.constant 0 : index
    %103 = vector.load %arg2[%c1072, %c0_47] : memref<3312x256xbf16, #tpu.memory_space<vmem>>, vector<1x128xbf16>
    %104 = arith.truncf %99 : vector<26x128xf32> to vector<26x128xbf16>
    %cst_48 = arith.constant dense<0.000000e+00> : vector<26x128xf32>
    %105 = tpu.matmul %0, %104, %cst_48 {dimension_numbers = #tpu.dot_dimension_numbers<[1], [0], [0], [1], [0, 0, 1, 1], [], []>} : vector<26x26xbf16>, vector<26x128xbf16>, vector<26x128xf32> -> vector<26x128xf32>
    %106 = arith.truncf %105 : vector<26x128xf32> to vector<26x128xbf16>
    %cst_49 = arith.constant dense<0.000000e+00> : vector<26x128xf32>
    %107 = tpu.matmul %106, %100, %cst_49 {dimension_numbers = #tpu.dot_dimension_numbers<[1], [0], [0], [1], [0, 0, 1, 1], [], []>} : vector<26x128xbf16>, vector<128x128xbf16>, vector<26x128xf32> -> vector<26x128xf32>
    %108 = arith.extf %101 : vector<1x128xbf16> to vector<1x128xf32>
    %109 = vector.broadcast %108 : vector<1x128xf32> to vector<26x128xf32>
    %110 = arith.addf %107, %109 : vector<26x128xf32>
    %cst_50 = arith.constant 0.000000e+00 : f32
    %111 = vector.broadcast %cst_50 : f32 to vector<26x128xf32>
    %112 = arith.maximumf %110, %111 : vector<26x128xf32>
    %113 = arith.truncf %112 : vector<26x128xf32> to vector<26x128xbf16>
    %cst_51 = arith.constant dense<0.000000e+00> : vector<26x128xf32>
    %114 = tpu.matmul %113, %102, %cst_51 {dimension_numbers = #tpu.dot_dimension_numbers<[1], [0], [0], [1], [0, 0, 1, 1], [], []>} : vector<26x128xbf16>, vector<128x128xbf16>, vector<26x128xf32> -> vector<26x128xf32>
    %115 = arith.extf %103 : vector<1x128xbf16> to vector<1x128xf32>
    %116 = vector.broadcast %115 : vector<1x128xf32> to vector<26x128xf32>
    %117 = arith.addf %114, %116 : vector<26x128xf32>
    %cst_52 = arith.constant 0.000000e+00 : f32
    %118 = vector.broadcast %cst_52 : f32 to vector<26x128xf32>
    %119 = arith.maximumf %117, %118 : vector<26x128xf32>
    %120 = arith.addf %119, %99 : vector<26x128xf32>
    %c1088 = arith.constant 1088 : index
    %c0_53 = arith.constant 0 : index
    %121 = vector.load %arg2[%c1088, %c0_53] : memref<3312x256xbf16, #tpu.memory_space<vmem>>, vector<128x128xbf16>
    %c1216 = arith.constant 1216 : index
    %c0_54 = arith.constant 0 : index
    %122 = vector.load %arg2[%c1216, %c0_54] : memref<3312x256xbf16, #tpu.memory_space<vmem>>, vector<1x128xbf16>
    %c1232 = arith.constant 1232 : index
    %c0_55 = arith.constant 0 : index
    %123 = vector.load %arg2[%c1232, %c0_55] : memref<3312x256xbf16, #tpu.memory_space<vmem>>, vector<128x128xbf16>
    %c1360 = arith.constant 1360 : index
    %c0_56 = arith.constant 0 : index
    %124 = vector.load %arg2[%c1360, %c0_56] : memref<3312x256xbf16, #tpu.memory_space<vmem>>, vector<1x128xbf16>
    %125 = arith.truncf %120 : vector<26x128xf32> to vector<26x128xbf16>
    %cst_57 = arith.constant dense<0.000000e+00> : vector<26x128xf32>
    %126 = tpu.matmul %0, %125, %cst_57 {dimension_numbers = #tpu.dot_dimension_numbers<[1], [0], [0], [1], [0, 0, 1, 1], [], []>} : vector<26x26xbf16>, vector<26x128xbf16>, vector<26x128xf32> -> vector<26x128xf32>
    %127 = arith.truncf %126 : vector<26x128xf32> to vector<26x128xbf16>
    %cst_58 = arith.constant dense<0.000000e+00> : vector<26x128xf32>
    %128 = tpu.matmul %127, %121, %cst_58 {dimension_numbers = #tpu.dot_dimension_numbers<[1], [0], [0], [1], [0, 0, 1, 1], [], []>} : vector<26x128xbf16>, vector<128x128xbf16>, vector<26x128xf32> -> vector<26x128xf32>
    %129 = arith.extf %122 : vector<1x128xbf16> to vector<1x128xf32>
    %130 = vector.broadcast %129 : vector<1x128xf32> to vector<26x128xf32>
    %131 = arith.addf %128, %130 : vector<26x128xf32>
    %cst_59 = arith.constant 0.000000e+00 : f32
    %132 = vector.broadcast %cst_59 : f32 to vector<26x128xf32>
    %133 = arith.maximumf %131, %132 : vector<26x128xf32>
    %134 = arith.truncf %133 : vector<26x128xf32> to vector<26x128xbf16>
    %cst_60 = arith.constant dense<0.000000e+00> : vector<26x128xf32>
    %135 = tpu.matmul %134, %123, %cst_60 {dimension_numbers = #tpu.dot_dimension_numbers<[1], [0], [0], [1], [0, 0, 1, 1], [], []>} : vector<26x128xbf16>, vector<128x128xbf16>, vector<26x128xf32> -> vector<26x128xf32>
    %136 = arith.extf %124 : vector<1x128xbf16> to vector<1x128xf32>
    %137 = vector.broadcast %136 : vector<1x128xf32> to vector<26x128xf32>
    %138 = arith.addf %135, %137 : vector<26x128xf32>
    %cst_61 = arith.constant 0.000000e+00 : f32
    %139 = vector.broadcast %cst_61 : f32 to vector<26x128xf32>
    %140 = arith.maximumf %138, %139 : vector<26x128xf32>
    %141 = arith.addf %140, %120 : vector<26x128xf32>
    %c1376 = arith.constant 1376 : index
    %c0_62 = arith.constant 0 : index
    %142 = vector.load %arg2[%c1376, %c0_62] : memref<3312x256xbf16, #tpu.memory_space<vmem>>, vector<128x256xbf16>
    %c1504 = arith.constant 1504 : index
    %c0_63 = arith.constant 0 : index
    %143 = vector.load %arg2[%c1504, %c0_63] : memref<3312x256xbf16, #tpu.memory_space<vmem>>, vector<1x256xbf16>
    %c1520 = arith.constant 1520 : index
    %c0_64 = arith.constant 0 : index
    %144 = vector.load %arg2[%c1520, %c0_64] : memref<3312x256xbf16, #tpu.memory_space<vmem>>, vector<256x256xbf16>
    %c1776 = arith.constant 1776 : index
    %c0_65 = arith.constant 0 : index
    %145 = vector.load %arg2[%c1776, %c0_65] : memref<3312x256xbf16, #tpu.memory_space<vmem>>, vector<1x256xbf16>
    %c1792 = arith.constant 1792 : index
    %c0_66 = arith.constant 0 : index
    %146 = vector.load %arg2[%c1792, %c0_66] : memref<3312x256xbf16, #tpu.memory_space<vmem>>, vector<128x256xbf16>
    %c1920 = arith.constant 1920 : index
    %c0_67 = arith.constant 0 : index
    %147 = vector.load %arg2[%c1920, %c0_67] : memref<3312x256xbf16, #tpu.memory_space<vmem>>, vector<1x256xbf16>
    %148 = arith.truncf %141 : vector<26x128xf32> to vector<26x128xbf16>
    %cst_68 = arith.constant dense<0.000000e+00> : vector<26x256xf32>
    %149 = tpu.matmul %148, %146, %cst_68 {dimension_numbers = #tpu.dot_dimension_numbers<[1], [0], [0], [1], [0, 0, 1, 1], [], []>} : vector<26x128xbf16>, vector<128x256xbf16>, vector<26x256xf32> -> vector<26x256xf32>
    %150 = arith.extf %147 : vector<1x256xbf16> to vector<1x256xf32>
    %151 = vector.broadcast %150 : vector<1x256xf32> to vector<26x256xf32>
    %152 = arith.addf %149, %151 : vector<26x256xf32>
    %153 = arith.truncf %141 : vector<26x128xf32> to vector<26x128xbf16>
    %cst_69 = arith.constant dense<0.000000e+00> : vector<26x128xf32>
    %154 = tpu.matmul %0, %153, %cst_69 {dimension_numbers = #tpu.dot_dimension_numbers<[1], [0], [0], [1], [0, 0, 1, 1], [], []>} : vector<26x26xbf16>, vector<26x128xbf16>, vector<26x128xf32> -> vector<26x128xf32>
    %155 = arith.truncf %154 : vector<26x128xf32> to vector<26x128xbf16>
    %cst_70 = arith.constant dense<0.000000e+00> : vector<26x256xf32>
    %156 = tpu.matmul %155, %142, %cst_70 {dimension_numbers = #tpu.dot_dimension_numbers<[1], [0], [0], [1], [0, 0, 1, 1], [], []>} : vector<26x128xbf16>, vector<128x256xbf16>, vector<26x256xf32> -> vector<26x256xf32>
    %157 = arith.extf %143 : vector<1x256xbf16> to vector<1x256xf32>
    %158 = vector.broadcast %157 : vector<1x256xf32> to vector<26x256xf32>
    %159 = arith.addf %156, %158 : vector<26x256xf32>
    %cst_71 = arith.constant 0.000000e+00 : f32
    %160 = vector.broadcast %cst_71 : f32 to vector<26x256xf32>
    %161 = arith.maximumf %159, %160 : vector<26x256xf32>
    %162 = arith.truncf %161 : vector<26x256xf32> to vector<26x256xbf16>
    %cst_72 = arith.constant dense<0.000000e+00> : vector<26x256xf32>
    %163 = tpu.matmul %162, %144, %cst_72 {dimension_numbers = #tpu.dot_dimension_numbers<[1], [0], [0], [1], [0, 0, 1, 1], [], []>} : vector<26x256xbf16>, vector<256x256xbf16>, vector<26x256xf32> -> vector<26x256xf32>
    %164 = arith.extf %145 : vector<1x256xbf16> to vector<1x256xf32>
    %165 = vector.broadcast %164 : vector<1x256xf32> to vector<26x256xf32>
    %166 = arith.addf %163, %165 : vector<26x256xf32>
    %cst_73 = arith.constant 0.000000e+00 : f32
    %167 = vector.broadcast %cst_73 : f32 to vector<26x256xf32>
    %168 = arith.maximumf %166, %167 : vector<26x256xf32>
    %169 = arith.addf %168, %152 : vector<26x256xf32>
    %c1936 = arith.constant 1936 : index
    %c0_74 = arith.constant 0 : index
    %170 = vector.load %arg2[%c1936, %c0_74] : memref<3312x256xbf16, #tpu.memory_space<vmem>>, vector<256x256xbf16>
    %c2192 = arith.constant 2192 : index
    %c0_75 = arith.constant 0 : index
    %171 = vector.load %arg2[%c2192, %c0_75] : memref<3312x256xbf16, #tpu.memory_space<vmem>>, vector<1x256xbf16>
    %c2208 = arith.constant 2208 : index
    %c0_76 = arith.constant 0 : index
    %172 = vector.load %arg2[%c2208, %c0_76] : memref<3312x256xbf16, #tpu.memory_space<vmem>>, vector<256x256xbf16>
    %c2464 = arith.constant 2464 : index
    %c0_77 = arith.constant 0 : index
    %173 = vector.load %arg2[%c2464, %c0_77] : memref<3312x256xbf16, #tpu.memory_space<vmem>>, vector<1x256xbf16>
    %174 = arith.truncf %169 : vector<26x256xf32> to vector<26x256xbf16>
    %cst_78 = arith.constant dense<0.000000e+00> : vector<26x256xf32>
    %175 = tpu.matmul %0, %174, %cst_78 {dimension_numbers = #tpu.dot_dimension_numbers<[1], [0], [0], [1], [0, 0, 1, 1], [], []>} : vector<26x26xbf16>, vector<26x256xbf16>, vector<26x256xf32> -> vector<26x256xf32>
    %176 = arith.truncf %175 : vector<26x256xf32> to vector<26x256xbf16>
    %cst_79 = arith.constant dense<0.000000e+00> : vector<26x256xf32>
    %177 = tpu.matmul %176, %170, %cst_79 {dimension_numbers = #tpu.dot_dimension_numbers<[1], [0], [0], [1], [0, 0, 1, 1], [], []>} : vector<26x256xbf16>, vector<256x256xbf16>, vector<26x256xf32> -> vector<26x256xf32>
    %178 = arith.extf %171 : vector<1x256xbf16> to vector<1x256xf32>
    %179 = vector.broadcast %178 : vector<1x256xf32> to vector<26x256xf32>
    %180 = arith.addf %177, %179 : vector<26x256xf32>
    %cst_80 = arith.constant 0.000000e+00 : f32
    %181 = vector.broadcast %cst_80 : f32 to vector<26x256xf32>
    %182 = arith.maximumf %180, %181 : vector<26x256xf32>
    %183 = arith.truncf %182 : vector<26x256xf32> to vector<26x256xbf16>
    %cst_81 = arith.constant dense<0.000000e+00> : vector<26x256xf32>
    %184 = tpu.matmul %183, %172, %cst_81 {dimension_numbers = #tpu.dot_dimension_numbers<[1], [0], [0], [1], [0, 0, 1, 1], [], []>} : vector<26x256xbf16>, vector<256x256xbf16>, vector<26x256xf32> -> vector<26x256xf32>
    %185 = arith.extf %173 : vector<1x256xbf16> to vector<1x256xf32>
    %186 = vector.broadcast %185 : vector<1x256xf32> to vector<26x256xf32>
    %187 = arith.addf %184, %186 : vector<26x256xf32>
    %cst_82 = arith.constant 0.000000e+00 : f32
    %188 = vector.broadcast %cst_82 : f32 to vector<26x256xf32>
    %189 = arith.maximumf %187, %188 : vector<26x256xf32>
    %190 = arith.addf %189, %169 : vector<26x256xf32>
    %c2480 = arith.constant 2480 : index
    %c0_83 = arith.constant 0 : index
    %191 = vector.load %arg2[%c2480, %c0_83] : memref<3312x256xbf16, #tpu.memory_space<vmem>>, vector<256x256xbf16>
    %c2736 = arith.constant 2736 : index
    %c0_84 = arith.constant 0 : index
    %192 = vector.load %arg2[%c2736, %c0_84] : memref<3312x256xbf16, #tpu.memory_space<vmem>>, vector<1x256xbf16>
    %c2752 = arith.constant 2752 : index
    %c0_85 = arith.constant 0 : index
    %193 = vector.load %arg2[%c2752, %c0_85] : memref<3312x256xbf16, #tpu.memory_space<vmem>>, vector<256x256xbf16>
    %c3008 = arith.constant 3008 : index
    %c0_86 = arith.constant 0 : index
    %194 = vector.load %arg2[%c3008, %c0_86] : memref<3312x256xbf16, #tpu.memory_space<vmem>>, vector<1x256xbf16>
    %195 = arith.truncf %190 : vector<26x256xf32> to vector<26x256xbf16>
    %cst_87 = arith.constant dense<0.000000e+00> : vector<26x256xf32>
    %196 = tpu.matmul %0, %195, %cst_87 {dimension_numbers = #tpu.dot_dimension_numbers<[1], [0], [0], [1], [0, 0, 1, 1], [], []>} : vector<26x26xbf16>, vector<26x256xbf16>, vector<26x256xf32> -> vector<26x256xf32>
    %197 = arith.truncf %196 : vector<26x256xf32> to vector<26x256xbf16>
    %cst_88 = arith.constant dense<0.000000e+00> : vector<26x256xf32>
    %198 = tpu.matmul %197, %191, %cst_88 {dimension_numbers = #tpu.dot_dimension_numbers<[1], [0], [0], [1], [0, 0, 1, 1], [], []>} : vector<26x256xbf16>, vector<256x256xbf16>, vector<26x256xf32> -> vector<26x256xf32>
    %199 = arith.extf %192 : vector<1x256xbf16> to vector<1x256xf32>
    %200 = vector.broadcast %199 : vector<1x256xf32> to vector<26x256xf32>
    %201 = arith.addf %198, %200 : vector<26x256xf32>
    %cst_89 = arith.constant 0.000000e+00 : f32
    %202 = vector.broadcast %cst_89 : f32 to vector<26x256xf32>
    %203 = arith.maximumf %201, %202 : vector<26x256xf32>
    %204 = arith.truncf %203 : vector<26x256xf32> to vector<26x256xbf16>
    %cst_90 = arith.constant dense<0.000000e+00> : vector<26x256xf32>
    %205 = tpu.matmul %204, %193, %cst_90 {dimension_numbers = #tpu.dot_dimension_numbers<[1], [0], [0], [1], [0, 0, 1, 1], [], []>} : vector<26x256xbf16>, vector<256x256xbf16>, vector<26x256xf32> -> vector<26x256xf32>
    %206 = arith.extf %194 : vector<1x256xbf16> to vector<1x256xf32>
    %207 = vector.broadcast %206 : vector<1x256xf32> to vector<26x256xf32>
    %208 = arith.addf %205, %207 : vector<26x256xf32>
    %cst_91 = arith.constant 0.000000e+00 : f32
    %209 = vector.broadcast %cst_91 : f32 to vector<26x256xf32>
    %210 = arith.maximumf %208, %209 : vector<26x256xf32>
    %211 = arith.addf %210, %190 : vector<26x256xf32>
    %c3024 = arith.constant 3024 : index
    %c0_92 = arith.constant 0 : index
    %212 = vector.load %arg2[%c3024, %c0_92] : memref<3312x256xbf16, #tpu.memory_space<vmem>>, vector<2x26xbf16>
    %c3040 = arith.constant 3040 : index
    %c0_93 = arith.constant 0 : index
    %213 = vector.load %arg2[%c3040, %c0_93] : memref<3312x256xbf16, #tpu.memory_space<vmem>>, vector<256x128xbf16>
    %c3296 = arith.constant 3296 : index
    %c0_94 = arith.constant 0 : index
    %214 = vector.load %arg2[%c3296, %c0_94] : memref<3312x256xbf16, #tpu.memory_space<vmem>>, vector<1x128xbf16>
    %215 = arith.truncf %211 : vector<26x256xf32> to vector<26x256xbf16>
    %cst_95 = arith.constant dense<0.000000e+00> : vector<2x256xf32>
    %216 = tpu.matmul %212, %215, %cst_95 {dimension_numbers = #tpu.dot_dimension_numbers<[1], [0], [0], [1], [0, 0, 1, 1], [], []>} : vector<2x26xbf16>, vector<26x256xbf16>, vector<2x256xf32> -> vector<2x256xf32>
    %217 = arith.truncf %216 : vector<2x256xf32> to vector<2x256xbf16>
    %cst_96 = arith.constant dense<0.000000e+00> : vector<2x128xf32>
    %218 = tpu.matmul %217, %213, %cst_96 {dimension_numbers = #tpu.dot_dimension_numbers<[1], [0], [0], [1], [0, 0, 1, 1], [], []>} : vector<2x256xbf16>, vector<256x128xbf16>, vector<2x128xf32> -> vector<2x128xf32>
    %219 = arith.extf %214 : vector<1x128xbf16> to vector<1x128xf32>
    %220 = vector.broadcast %219 : vector<1x128xf32> to vector<2x128xf32>
    %221 = arith.addf %218, %220 : vector<2x128xf32>
    %c0_97 = arith.constant 0 : index
    %c0_98 = arith.constant 0 : index
    %222 = vector.load %arg3[%c0_97, %c0_98] : memref<2x128xf32, #tpu.memory_space<vmem>>, vector<2x128xf32>
    tpu.vector_store %arg3[%c0_97, %c0_98], %221 {strides = array<i32>} : memref<2x128xf32, #tpu.memory_space<vmem>>, vector<2x128xf32>,
    return
  }
  func.func @transform_0(%arg0: i32) -> (i32, i32) {
    %c0_i32 = arith.constant 0 : i32
    %c0_i32_0 = arith.constant 0 : i32
    %c0_i32_1 = arith.constant 0 : i32
    return %c0_i32, %c0_i32_0 : i32, i32
  }
  func.func @transform_1(%arg0: i32) -> (i32, i32) {
    %c0_i32 = arith.constant 0 : i32
    %c0_i32_0 = arith.constant 0 : i32
    %c0_i32_1 = arith.constant 0 : i32
    return %c0_i32, %c0_i32_0 : i32, i32
  }
  func.func @transform_2(%arg0: i32) -> (i32, i32) {
    %c0_i32 = arith.constant 0 : i32
    %c0_i32_0 = arith.constant 0 : i32
    %c0_i32_1 = arith.constant 0 : i32
    return %c0_i32, %c0_i32_0 : i32, i32
  }
}

</mosaic_0001>

<bundles_post_ra>
// kernel: tpu_custom_call.1
= control target key start
LH: loop header
LB: loop body
LE: loop exit
PB: predicated region body
PF: predicated region fallthrough
CT: control target
= control target key end

     0   :  { %7 = vsyncpa [#allocation3], 0  ;;  %s5467_s0 = inlined_call_operand.vmem [shape: f32[26,3], index: 0, kind: input, shape index: {}]   ;;  %s5468_s1 = inlined_call_operand.hbm [shape: bf16[3312,256], index: 1, kind: input, shape index: {}]   ;;  %s5469_s2 = inlined_call_operand.hbm [shape: f32[2,128], index: 2, kind: output, shape index: {}]  }
   0x1   :  { %8 = vsyncpa [#allocation4], 0  ;;  %s5131_s9 = smov [#allocation2]   ;;  %s5083_s13 = scalar_lea.hbm %s5468_s1, 52992 }
   0x2   :  { %s16_s10 = sshll.u32 %s5131_s9, 4  ;;  %p5084_p0 = scmp.ne.s32.totalorder %s5468_s1, %s5083_s13  ;;  %s17_s10 = int_to_ptr.vmem [resolvable:$true] %s16_s10 }
   0x3   :  { %p5087_p1 = scmp.lt.u32.totalorder %s5083_s13, %s5468_s1 }
   0x5   :  { %p5089_p2 = pnand %p5087_p1, %p5084_p0 }
   0x7   :  { %5092 = shalt.err (!%p5089_p2)
}
   0x8   :  { %s5093_s18 = scalar_lea.vmem %s17_s10, 52992  ;;  %p5098_p4 = scmp.lt.s32.totalorder %s17_s10, %s17_s10 }
   0x9   :  { %p5094_p3 = scmp.ne.s32.totalorder %s17_s10, %s5093_s18  ;;  %p5099_p5 = scmp.lt.s32.totalorder %s5093_s18, %s5093_s18 }
   0xb   :  { %p5100_p6 = por %p5099_p5, %p5098_p4 }
   0xd   :  { %p5101_p7 = pnand %p5100_p6, %p5094_p3 }
   0xf   :  { %5104 = shalt.err (!%p5101_p7)
}
  0x10   :  { %s5132_s19 = smov 128   ;;  %s5133_s20 = smov 8  }
  0x11   :  { %22 = dma.hbm_to_vmem [thread:$0]  %s5468_s1, 52992, %s17_s10, [#allocation3], %s5132_s19, %s5132_s19, %s5133_s20  }
  0x12   :  { %5127 = dma.done.wait [#allocation3], 52992  }
  0x13   :  { %5128 = vsyncadd [#allocation3], 4294914304  ;;  %vm62_vm0 = vcmask 1040384   ;;  %vm63_vm1 = vcmask 1041408   ;;  %v5134_v0 = vmov 65535   ;;  %vm135_vm2 = vcmask 1044480  }
  0x14   :  { %v64_v1 = vsel %vm62_vm0, 4294967295, %v5134_v0  ;;  %v31_v2 = vld [vmem:[%s5467_s0] sm:$0xff]  ;;  %v32_v3 = vld [vmem:[%s5467_s0 + $0x8] sm:$0xff]  ;;  %v33_v4 = vld [vmem:[%s5467_s0 + $0x10] sm:$0xff]  ;;  %vm128_vm3 = vcmask 211968   ;;  %vm55_vm4 = vcmask 23552   ;;  %v51_v30 = vlaneseq }
  0x15   :  { %v65_v5 = vsel %vm63_vm1, %v64_v1, 0  ;;  %v48_v6 = vpack.c.bf16 %v32_v3, %v31_v2  ;;  %v34_v7 = vld [vmem:[%s5467_s0 + $0x18] sm:$0x3]  ;;  %v5176_v9 = vld [vmem:[#allocation2] ss:$8 sps:$4 sm:$0xff]   ;;  %vm287_vm5 = vcmask 523264  }
  0x16   :  { %v49_v8 = vpack.c.bf16 %v34_v7, %v33_v4  ;;  %v35_v10 = vld [vmem:[#allocation2 + $0x20] sm:$0x3]  ;;  %4450 = vmatprep.mubr.msk.bf16.mxu1 %vm128_vm3, %v5176_v9  ;;  %v46_v12 = vld [vmem:[#allocation2 + $0x90] sm:$0x3]  ;;  %v52_v32 = vshrl.u32 %v51_v30, 7  ;;  %s5136_s0 = smov [#allocation5]  }
  0x17   :  { %4446 = vmatprep.subr.bf16.mxu1 %v48_v6  ;;  %4442 = vmatprep.mubr.msk.bf16.mxu0 %vm55_vm4, %v48_v6  ;;  %v5183_v13 = vld [vmem:[#allocation2 + $0x10] ss:$8 sps:$4 sm:$0x1f]   ;;  %v67_v14 = vand.u32 %v65_v5, %v46_v12  ;;  %v201_v15 = vand.u32 %v65_v5, %v35_v10  ;;  %v4707_v16 = vld [vmem:[#allocation2 + $0x40] ss:$8 sps:$4 sm:$0xff]   ;;  %s3965_s30 = sshll.u32 %s5136_s0, 4  ;;  %s3966_s30 = int_to_ptr.vmem [resolvable:$true] %s3965_s30 }
  0x18   :  { %4447 = vmatpush3.bf16.msra.mxu1 %v48_v6  ;;  %v136_v11 = vsel %vm135_vm2, %v49_v8, 0  ;;  %v4708_v17 = vld [vmem:[#allocation2 + $0x50] ss:$8 sps:$4 sm:$0xff]   ;;  %v4709_v28 = vld [vmem:[#allocation2 + $0x60] ss:$8 sps:$4 sm:$0xff]   ;;  %v5192_v34 = vsub.s32 0, %v52_v32  ;;  %p5110_p9 = scmp.lt.s32.totalorder %s3966_s30, %s3966_s30 }
  0x19   :  { %4692 = vmatprep.subr.msk.bf16.mxu1 %vm135_vm2, %v49_v8  ;;  %4440 = vmatprep.subr.bf16.mxu0 %v67_v14  ;;  %v4710_v29 = vld [vmem:[#allocation2 + $0x70] ss:$8 sps:$4 sm:$0xff]   ;;  %v45_v50 = vld [vmem:[#allocation2 + $0x80] sm:$0x1]  ;;  %s5105_s3 = scalar_lea.vmem %s3966_s30, 32 }
  0x1a   :  { %4441 = vmatpush3.bf16.msra.mxu0 %v67_v14  ;;  %v36_v31 = vld [vmem:[#allocation2 + $0x30] sm:$0x1]  ;;  %v47_v51 = vld [vmem:[#allocation2 + $0xa0] sm:$0x1]  ;;  %v258_v52 = vunpack.c.l.bf16 %v45_v50  ;;  %p5106_p8 = scmp.ne.s32.totalorder %s3966_s30, %s5105_s3  ;;  %p5111_p10 = scmp.lt.s32.totalorder %s5105_s3, %s5105_s3 }
  0x1b   :  { %4454 = vmatprep.subr.bf16.mxu0 %v201_v15  ;;  %v189_v33 = vunpack.c.l.bf16 %v36_v31  ;;  %v50_v53 = vunpack.c.l.bf16 %v47_v51  ;;  %v359_v30 = vld [vmem:[#allocation2 + $0xf0] sm:$0x1]  ;;  %v368_v50 = vld [vmem:[#allocation2 + $0x140] sm:$0x1] }
  0x1c   :  { %4449 = vmatpush3.bf16.msra.mxu1 %v136_v11  ;;  %v262_v54 = vrot.slane %v258_v52, %v5192_v34  ;;  %v425_v31 = vunpack.c.l.bf16 %v359_v30  ;;  %v515_v51 = vunpack.c.l.bf16 %v368_v50  ;;  %p5112_p11 = por %p5111_p10, %p5110_p9 }
  0x1d   :  { %4443 = vmatmul.mubr.msk.bf16.vlgmr.msra.gmra.mrb[0].mxu0 %vm55_vm4, %v49_v8  ;;  %4460 = vmatprep.subr.bf16.mxu1 %v4707_v16  ;;  %v193_v35 = vrot.slane %v189_v33, %v5192_v34  ;;  %v54_v55 = vrot.slane %v50_v53, %v5192_v34 }
  0x1e   :  { %4455 = vmatpush3.bf16.msra.mxu0 %v201_v15  ;;  %v429_v32 = vrot.slane %v425_v31, %v5192_v34  ;;  %v519_v52 = vrot.slane %v515_v51, %v5192_v34  ;;  %p5113_p12 = pnand %p5112_p11, %p5106_p8 }
  0x1f   :  { %4451 = vmatmul.mubr.msk.bf16.vlgmr.msra.gmra.mrb[0].mxu1 %vm128_vm3, %v5183_v13 }
  0x20   :  { %4461 = vmatpush3.bf16.msra.mxu1 %v4707_v16  ;;  %v4711_v16 = vld [vmem:[#allocation2 + $0xb0] ss:$8 sps:$4 sm:$0xff]  }
  0x21   :  { %4462 = vmatprep.subr.bf16.mxu1 %v4708_v17 }
  0x24   :  { %4463 = vmatpush3.bf16.msra.mxu1 %v4708_v17 }
  0x25   :  { %4464 = vmatprep.subr.bf16.mxu1 %v4709_v28 }
  0x28   :  { %4465 = vmatpush3.bf16.msra.mxu1 %v4709_v28  ;;  %v4717_v28 = vld [vmem:[#allocation2 + $0x120] ss:$8 sps:$4 sm:$0xff]  }
  0x29   :  { %4466 = vmatprep.subr.bf16.mxu1 %v4710_v29 }
  0x2c   :  { %4467 = vmatpush3.bf16.msra.mxu1 %v4710_v29  ;;  %v4718_v29 = vld [vmem:[#allocation2 + $0x130] ss:$8 sps:$4 sm:$0xff]  }
  0xf0   :  { %v4444_v19 = vpop.f32.mrb[0].mxu0 }
  0xf1   :  { %v103_v21 = vpop.f32.mrb[1].mxu0  ;;  %v112_v61 = vadd.f32 %v4444_v19, %v54_v55  ;;  %v4713_v19 = vld [vmem:[#allocation2 + $0xd0] ss:$8 sps:$4 sm:$0xff]  }
  0xf2   :  { %v4452_v18 = vpop.f32.mrb[0].mxu1  ;;  %v4445_v23 = vpop.f32.mrb[2].mxu0  ;;  %v104_v1 = vadd.f32 %v103_v21, %v54_v55  ;;  %v4715_v21 = vld [vmem:[#allocation2 + $0x100] ss:$8 sps:$4 sm:$0xff]  }
  0xf3   :  { %v172_v20 = vpop.f32.mrb[1].mxu1  ;;  %v106_v26 = vpop.f32.mrb[3].mxu0  ;;  %v115_v4 = vadd.f32 %v4445_v23, %v54_v55  ;;  %4492 = vmatprep.subr.bf16.mxu1 %v4715_v21 }
  0xf4   :  { %v4453_v22 = vpop.f32.mrb[2].mxu1  ;;  %v107_v7 = vadd.f32 %v106_v26, %v54_v55 }
  0xf5   :  { %v188_v24 = vpack.c.bf16 %v4453_v22, %v4452_v18  ;;  %v175_v25 = vpop.f32.mrb[3].mxu1  ;;  %v4712_v18 = vld [vmem:[#allocation2 + $0xc0] ss:$8 sps:$4 sm:$0xff]   ;;  %v4716_v22 = vld [vmem:[#allocation2 + $0x110] ss:$8 sps:$4 sm:$0xff]  }
  0xf6   :  { %v187_v27 = vpack.c.bf16 %v175_v25, %v172_v20  ;;  %v4714_v20 = vld [vmem:[#allocation2 + $0xe0] ss:$8 sps:$4 sm:$0xff]  }
  0xf8   :  { %4456 = vmatprep.mubr.msk.bf16.mxu0 %vm55_vm4, %v187_v27 }
  0xf9   :  { %4457 = vmatmul.mubr.msk.bf16.vlgmr.msra.gmra.mrb[4].mxu0 %vm55_vm4, %v188_v24 }
  0xfa   :  { %4476 = vmatprep.mubr.msk.bf16.mxu0 %vm128_vm3, %v5176_v9 }
 0x1cc   :  { %v4458_v36 = vpop.f32.mrb[4].mxu0 }
 0x1cd   :  { %v246_v37 = vadd.f32 %v4458_v36, %v193_v35  ;;  %v237_v38 = vpop.f32.mrb[5].mxu0 }
 0x1ce   :  { %v238_v39 = vadd.f32 %v237_v38, %v193_v35  ;;  %v4459_v40 = vpop.f32.mrb[6].mxu0 }
 0x1cf   :  { %v249_v41 = vadd.f32 %v4459_v40, %v193_v35  ;;  %v240_v42 = vpop.f32.mrb[7].mxu0  ;;  %v254_v44 = vmax.f32 %v246_v37, 0.0 }
 0x1d0   :  { %v241_v43 = vadd.f32 %v240_v42, %v193_v35  ;;  %v252_v46 = vmax.f32 %v238_v39, 0.0 }
 0x1d1   :  { %v255_v45 = vmax.f32 %v249_v41, 0.0 }
 0x1d2   :  { %v253_v47 = vmax.f32 %v241_v43, 0.0 }
 0x1d3   :  { %v257_v48 = vpack.c.bf16 %v255_v45, %v254_v44 }
 0x1d4   :  { %v256_v49 = vpack.c.bf16 %v253_v47, %v252_v46  ;;  %v4719_v47 = vld [vmem:[#allocation2 + $0x150] ss:$8 sps:$4 sm:$0xff]  }
 0x1d6   :  { %4468 = vmatprep.mubr.msk.bf16.mxu1 %vm287_vm5, %v256_v49  ;;  %v4721_v49 = vld [vmem:[#allocation2 + $0x170] ss:$8 sps:$4 sm:$0xff]  }
 0x1d7   :  { %4469 = vmatmul.mubr.msk.bf16.vlgmr.msra.gmra.mrb[4].mxu1 %vm287_vm5, %v257_v48  ;;  %v4720_v48 = vld [vmem:[#allocation2 + $0x160] ss:$8 sps:$4 sm:$0xff]  }
 0x1d8   :  { %4493 = vmatpush3.bf16.msra.mxu1 %v4715_v21  ;;  %v4726_v21 = vld [vmem:[#allocation2 + $0x1d0] ss:$8 sps:$4 sm:$0xff]  }
 0x1d9   :  { %4494 = vmatprep.subr.bf16.mxu1 %v4716_v22 }
 0x1dc   :  { %4495 = vmatpush3.bf16.msra.mxu1 %v4716_v22  ;;  %v4727_v22 = vld [vmem:[#allocation2 + $0x2d0] ss:$8 sps:$4 sm:$0xff]  }
 0x1dd   :  { %4496 = vmatprep.subr.bf16.mxu1 %v4717_v28 }
 0x1e0   :  { %4497 = vmatpush3.bf16.msra.mxu1 %v4717_v28 }
 0x1e1   :  { %4498 = vmatprep.subr.bf16.mxu1 %v4718_v29 }
 0x1e4   :  { %4499 = vmatpush3.bf16.msra.mxu1 %v4718_v29 }
 0x1e5   :  { %4512 = vmatprep.subr.bf16.mxu1 %v4719_v47 }
 0x2aa   :  { %v4470_v56 = vpop.f32.mrb[4].mxu1 }
 0x2ab   :  { %v337_v57 = vadd.f32 %v4470_v56, %v262_v54  ;;  %v328_v58 = vpop.f32.mrb[5].mxu1 }
 0x2ac   :  { %v329_v59 = vadd.f32 %v328_v58, %v262_v54  ;;  %v4471_v60 = vpop.f32.mrb[6].mxu1 }
 0x2ad   :  { %v345_v62 = vmax.f32 %v337_v57, 0.0  ;;  %v340_v63 = vadd.f32 %v4471_v60, %v262_v54  ;;  %v331_v0 = vpop.f32.mrb[7].mxu1 }
 0x2ae   :  { %v343_v2 = vmax.f32 %v329_v59, 0.0  ;;  %v332_v3 = vadd.f32 %v331_v0, %v262_v54 }
 0x2af   :  { %v5199_v5 = vadd.f32 %v345_v62, %v112_v61  ;;  %v346_v6 = vmax.f32 %v340_v63, 0.0 }
 0x2b0   :  { %v5201_v8 = vadd.f32 %v343_v2, %v104_v1  ;;  %v344_v10 = vmax.f32 %v332_v3, 0.0 }
 0x2b1   :  { %v5203_v11 = vadd.f32 %v346_v6, %v115_v4 }
 0x2b2   :  { %v5205_v12 = vadd.f32 %v344_v10, %v107_v7  ;;  %v5241_v10 = vld [vmem:[#allocation2 + $0x10] ss:$8 sps:$4 sm:$0x1f]  }
 0x2b3   :  { %v370_v15 = vpack.c.bf16 %v5203_v11, %v5199_v5 }
 0x2b4   :  { %v369_v14 = vpack.c.bf16 %v5205_v12, %v5201_v8 }
 0x2b5   :  { %v372_v17 = vsel %vm135_vm2, %v370_v15, 0 }
 0x2b6   :  { %4472 = vmatprep.subr.bf16.mxu0 %v369_v14 }
 0x2b7   :  { %4473 = vmatpush3.bf16.msra.mxu0 %v369_v14 }
 0x2b8   :  { %4693 = vmatprep.subr.msk.bf16.mxu0 %vm135_vm2, %v370_v15 }
 0x2bb   :  { %4475 = vmatpush3.bf16.msra.mxu0 %v372_v17 }
 0x2bc   :  { %4480 = vmatprep.subr.bf16.mxu0 %v4711_v16 }
 0x2be   :  { %4477 = vmatmul.mubr.msk.bf16.vlgmr.msra.gmra.mrb[8].mxu0 %vm128_vm3, %v5183_v13 }
 0x2bf   :  { %4481 = vmatpush3.bf16.msra.mxu0 %v4711_v16 }
 0x2c0   :  { %4482 = vmatprep.subr.bf16.mxu0 %v4712_v18 }
 0x2c3   :  { %4483 = vmatpush3.bf16.msra.mxu0 %v4712_v18 }
 0x2c4   :  { %4484 = vmatprep.subr.bf16.mxu0 %v4713_v19 }
 0x2c7   :  { %4485 = vmatpush3.bf16.msra.mxu0 %v4713_v19 }
 0x2c8   :  { %4486 = vmatprep.subr.bf16.mxu0 %v4714_v20 }
 0x2cb   :  { %4487 = vmatpush3.bf16.msra.mxu0 %v4714_v20  ;;  %v4725_v20 = vld [vmem:[#allocation2 + $0x1c0] ss:$8 sps:$4 sm:$0xff]  }
 0x391   :  { %v4478_v23 = vpop.f32.mrb[8].mxu0 }
 0x392   :  { %v408_v24 = vpop.f32.mrb[9].mxu0 }
 0x393   :  { %v4479_v25 = vpop.f32.mrb[10].mxu0 }
 0x394   :  { %v424_v26 = vpack.c.bf16 %v4479_v25, %v4478_v23  ;;  %v411_v13 = vpop.f32.mrb[11].mxu0  ;;  %v615_v23 = vld [vmem:[#allocation2 + $0x190] sm:$0x1] }
 0x395   :  { %v423_v27 = vpack.c.bf16 %v411_v13, %v408_v24  ;;  %v681_v24 = vunpack.c.l.bf16 %v615_v23 }
 0x397   :  { %4488 = vmatprep.mubr.msk.bf16.mxu0 %vm287_vm5, %v423_v27  ;;  %v685_v25 = vrot.slane %v681_v24, %v5192_v34  ;;  %v4741_v24 = vld [vmem:[#allocation2 + $0x2a0] ss:$8 sps:$4 sm:$0xff]  }
 0x398   :  { %4489 = vmatmul.mubr.msk.bf16.vlgmr.msra.gmra.mrb[12].mxu0 %vm287_vm5, %v424_v26 }
 0x399   :  { %4508 = vmatprep.mubr.msk.bf16.mxu0 %vm128_vm3, %v5176_v9 }
 0x46b   :  { %v4490_v33 = vpop.f32.mrb[12].mxu0 }
 0x46c   :  { %v503_v35 = vadd.f32 %v4490_v33, %v429_v32  ;;  %v494_v36 = vpop.f32.mrb[13].mxu0 }
 0x46d   :  { %v495_v37 = vadd.f32 %v494_v36, %v429_v32  ;;  %v4491_v38 = vpop.f32.mrb[14].mxu0 }
 0x46e   :  { %v506_v39 = vadd.f32 %v4491_v38, %v429_v32  ;;  %v497_v40 = vpop.f32.mrb[15].mxu0  ;;  %v511_v42 = vmax.f32 %v503_v35, 0.0 }
 0x46f   :  { %v498_v41 = vadd.f32 %v497_v40, %v429_v32  ;;  %v509_v43 = vmax.f32 %v495_v37, 0.0  ;;  %v5250_v40 = vld [vmem:[#allocation2] ss:$8 sps:$4 sm:$0xff]  }
 0x470   :  { %v512_v9 = vmax.f32 %v506_v39, 0.0 }
 0x471   :  { %v510_v44 = vmax.f32 %v498_v41, 0.0  ;;  %v4728_v41 = vld [vmem:[#allocation2 + $0x2e0] ss:$8 sps:$4 sm:$0xff]  }
 0x472   :  { %v514_v45 = vpack.c.bf16 %v512_v9, %v511_v42  ;;  %v4729_v42 = vld [vmem:[#allocation2 + $0x2f0] ss:$8 sps:$4 sm:$0xff]   ;;  %v4730_v9 = vld [vmem:[#allocation2 + $0x300] ss:$8 sps:$4 sm:$0xff]  }
 0x473   :  { %v513_v46 = vpack.c.bf16 %v510_v44, %v509_v43  ;;  %v624_v43 = vld [vmem:[#allocation2 + $0x1e0] sm:$0x1] }
 0x474   :  { %v771_v44 = vunpack.c.l.bf16 %v624_v43  ;;  %v888_v43 = vld [vmem:[#allocation2 + $0x2c0] sm:$0x1] }
 0x475   :  { %4500 = vmatprep.mubr.msk.bf16.mxu1 %vm287_vm5, %v513_v46 }
 0x476   :  { %4501 = vmatmul.mubr.msk.bf16.vlgmr.msra.gmra.mrb[8].mxu1 %vm287_vm5, %v514_v45  ;;  %v775_v45 = vrot.slane %v771_v44, %v5192_v34  ;;  %v897_v44 = vld [vmem:[#allocation2 + $0x310] sm:$0x1] }
 0x477   :  { %4513 = vmatpush3.bf16.msra.mxu1 %v4719_v47 }
 0x478   :  { %4514 = vmatprep.subr.bf16.mxu1 %v4720_v48 }
 0x47b   :  { %4515 = vmatpush3.bf16.msra.mxu1 %v4720_v48 }
 0x47c   :  { %4516 = vmatprep.subr.bf16.mxu1 %v4721_v49 }
 0x47f   :  { %4517 = vmatpush3.bf16.msra.mxu1 %v4721_v49 }
 0x549   :  { %v4502_v53 = vpop.f32.mrb[8].mxu1 }
 0x54a   :  { %v584_v54 = vpop.f32.mrb[9].mxu1  ;;  %v593_v55 = vadd.f32 %v4502_v53, %v519_v52 }
 0x54b   :  { %v585_v56 = vadd.f32 %v584_v54, %v519_v52  ;;  %v4503_v57 = vpop.f32.mrb[10].mxu1 }
 0x54c   :  { %v596_v58 = vadd.f32 %v4503_v57, %v519_v52  ;;  %v587_v59 = vpop.f32.mrb[11].mxu1  ;;  %v601_v63 = vmax.f32 %v593_v55, 0.0 }
 0x54d   :  { %v599_v60 = vmax.f32 %v585_v56, 0.0  ;;  %v588_v61 = vadd.f32 %v587_v59, %v519_v52 }
 0x54e   :  { %v602_v62 = vmax.f32 %v596_v58, 0.0  ;;  %v5233_v4 = vadd.f32 %v601_v63, %v5199_v5  ;;  %v4722_v5 = vld [vmem:[#allocation2 + $0x180] ss:$8 sps:$4 sm:$0xff]  }
 0x54f   :  { %v600_v0 = vmax.f32 %v588_v61, 0.0  ;;  %v5224_v1 = vadd.f32 %v599_v60, %v5201_v8  ;;  %4518 = vmatprep.subr.bf16.mxu1 %v4722_v5 }
 0x550   :  { %v5227_v2 = vadd.f32 %v602_v62, %v5203_v11  ;;  %4519 = vmatpush3.bf16.msra.mxu1 %v4722_v5  ;;  %v4723_v11 = vld [vmem:[#allocation2 + $0x1a0] ss:$8 sps:$4 sm:$0xff]   ;;  %v4738_v5 = vld [vmem:[#allocation2 + $0x270] ss:$8 sps:$4 sm:$0xff]  }
 0x551   :  { %v5230_v3 = vadd.f32 %v600_v0, %v5205_v12  ;;  %v4724_v12 = vld [vmem:[#allocation2 + $0x1b0] ss:$8 sps:$4 sm:$0xff]   ;;  %4536 = vmatprep.subr.bf16.mxu1 %v4727_v22 }
 0x552   :  { %v626_v7 = vpack.c.bf16 %v5227_v2, %v5233_v4  ;;  %v4731_v0 = vld [vmem:[#allocation2 + $0x1f0] ss:$8 sps:$4 sm:$0xff]  }
 0x553   :  { %v625_v6 = vpack.c.bf16 %v5230_v3, %v5224_v1 }
 0x554   :  { %v628_v8 = vsel %vm135_vm2, %v626_v7, 0 }
 0x555   :  { %4504 = vmatprep.subr.bf16.mxu0 %v625_v6 }
 0x556   :  { %4505 = vmatpush3.bf16.msra.mxu0 %v625_v6 }
 0x557   :  { %4694 = vmatprep.subr.msk.bf16.mxu0 %vm135_vm2, %v626_v7  ;;  %v4736_v7 = vld [vmem:[#allocation2 + $0x250] ss:$8 sps:$4 sm:$0xff]  }
 0x55a   :  { %4507 = vmatpush3.bf16.msra.mxu0 %v628_v8  ;;  %v4737_v8 = vld [vmem:[#allocation2 + $0x260] ss:$8 sps:$4 sm:$0xff]  }
 0x55b   :  { %4524 = vmatprep.subr.bf16.mxu0 %v4723_v11 }
 0x55d   :  { %4509 = vmatmul.mubr.msk.bf16.vlgmr.msra.gmra.mrb[16].mxu0 %vm128_vm3, %v5241_v10 }
 0x55e   :  { %4525 = vmatpush3.bf16.msra.mxu0 %v4723_v11  ;;  %v4739_v11 = vld [vmem:[#allocation2 + $0x280] ss:$8 sps:$4 sm:$0xff]  }
 0x55f   :  { %4526 = vmatprep.subr.bf16.mxu0 %v4724_v12 }
 0x562   :  { %4527 = vmatpush3.bf16.msra.mxu0 %v4724_v12  ;;  %v4740_v12 = vld [vmem:[#allocation2 + $0x290] ss:$8 sps:$4 sm:$0xff]  }
 0x563   :  { %4528 = vmatprep.subr.bf16.mxu0 %v4725_v20 }
 0x566   :  { %4529 = vmatpush3.bf16.msra.mxu0 %v4725_v20 }
 0x567   :  { %4530 = vmatprep.subr.bf16.mxu0 %v4726_v21 }
 0x56a   :  { %4531 = vmatpush3.bf16.msra.mxu0 %v4726_v21 }
 0x630   :  { %v4510_v14 = vpop.f32.mrb[16].mxu0 }
 0x631   :  { %v664_v15 = vpop.f32.mrb[17].mxu0 }
 0x632   :  { %v4511_v16 = vpop.f32.mrb[18].mxu0 }
 0x633   :  { %v680_v17 = vpack.c.bf16 %v4511_v16, %v4510_v14  ;;  %v667_v18 = vpop.f32.mrb[19].mxu0 }
 0x634   :  { %v679_v19 = vpack.c.bf16 %v667_v18, %v664_v15 }
 0x636   :  { %4520 = vmatprep.mubr.msk.bf16.mxu1 %vm287_vm5, %v679_v19 }
 0x637   :  { %4521 = vmatmul.mubr.msk.bf16.vlgmr.msra.gmra.mrb[12].mxu1 %vm287_vm5, %v680_v17 }
 0x638   :  { %4537 = vmatpush3.bf16.msra.mxu1 %v4727_v22 }
 0x639   :  { %4538 = vmatprep.subr.bf16.mxu1 %v4728_v41 }
 0x63c   :  { %4539 = vmatpush3.bf16.msra.mxu1 %v4728_v41 }
 0x63d   :  { %4540 = vmatprep.subr.bf16.mxu1 %v4729_v42 }
 0x640   :  { %4541 = vmatpush3.bf16.msra.mxu1 %v4729_v42 }
 0x641   :  { %4542 = vmatprep.subr.bf16.mxu1 %v4730_v9 }
 0x644   :  { %4543 = vmatpush3.bf16.msra.mxu1 %v4730_v9 }
 0x70a   :  { %v4522_v26 = vpop.f32.mrb[12].mxu1 }
 0x70b   :  { %v759_v13 = vadd.f32 %v4522_v26, %v685_v25  ;;  %v750_v27 = vpop.f32.mrb[13].mxu1  ;;  %v871_v26 = vld [vmem:[#allocation2 + $0x230] sm:$0x1] }
 0x70c   :  { %v751_v28 = vadd.f32 %v750_v27, %v685_v25  ;;  %v4523_v29 = vpop.f32.mrb[14].mxu1 }
 0x70d   :  { %v762_v30 = vadd.f32 %v4523_v29, %v685_v25  ;;  %v753_v31 = vpop.f32.mrb[15].mxu1  ;;  %v767_v33 = vmax.f32 %v759_v13, 0.0  ;;  %v1037_v13 = vunpack.c.l.bf16 %v871_v26 }
 0x70e   :  { %v754_v32 = vadd.f32 %v753_v31, %v685_v25  ;;  %v765_v36 = vmax.f32 %v751_v28, 0.0  ;;  %v4742_v25 = vld [vmem:[#allocation2 + $0x2b0] ss:$8 sps:$4 sm:$0xff]  }
 0x70f   :  { %v768_v35 = vmax.f32 %v762_v30, 0.0  ;;  %v1041_v27 = vrot.slane %v1037_v13, %v5192_v34 }
 0x710   :  { %v766_v37 = vmax.f32 %v754_v32, 0.0 }
 0x711   :  { %v770_v38 = vpack.c.bf16 %v768_v35, %v767_v33 }
 0x712   :  { %v769_v39 = vpack.c.bf16 %v766_v37, %v765_v36 }
 0x714   :  { %4532 = vmatprep.mubr.msk.bf16.mxu0 %vm287_vm5, %v769_v39 }
 0x715   :  { %4533 = vmatmul.mubr.msk.bf16.vlgmr.msra.gmra.mrb[20].mxu0 %vm287_vm5, %v770_v38 }
 0x716   :  { %4552 = vmatprep.mubr.msk.bf16.mxu0 %vm128_vm3, %v5250_v40 }
 0x7e8   :  { %v4534_v46 = vpop.f32.mrb[20].mxu0 }
 0x7e9   :  { %v849_v47 = vadd.f32 %v4534_v46, %v775_v45  ;;  %v840_v48 = vpop.f32.mrb[21].mxu0  ;;  %v900_v46 = vunpack.c.l.bf16 %v897_v44 }
 0x7ea   :  { %v841_v49 = vadd.f32 %v840_v48, %v775_v45  ;;  %v4535_v50 = vpop.f32.mrb[22].mxu0 }
 0x7eb   :  { %v857_v51 = vmax.f32 %v849_v47, 0.0  ;;  %v852_v52 = vadd.f32 %v4535_v50, %v775_v45  ;;  %v843_v53 = vpop.f32.mrb[23].mxu0  ;;  %v904_v48 = vrot.slane %v900_v46, %v5192_v34 }
 0x7ec   :  { %v855_v54 = vmax.f32 %v841_v49, 0.0  ;;  %v844_v55 = vadd.f32 %v843_v53, %v775_v45  ;;  %v1127_v45 = vunpack.c.l.bf16 %v888_v43 }
 0x7ed   :  { %v858_v56 = vmax.f32 %v852_v52, 0.0  ;;  %v861_v58 = vadd.f32 %v857_v51, %v5233_v4  ;;  %v4735_v4 = vld [vmem:[#allocation2 + $0x240] ss:$8 sps:$4 sm:$0xff]  }
 0x7ee   :  { %v856_v57 = vmax.f32 %v844_v55, 0.0  ;;  %v859_v60 = vadd.f32 %v855_v54, %v5224_v1  ;;  %v4732_v1 = vld [vmem:[#allocation2 + $0x200] ss:$8 sps:$4 sm:$0xff]   ;;  %4568 = vmatprep.subr.bf16.mxu1 %v4735_v4  ;;  %v1131_v47 = vrot.slane %v1127_v45, %v5192_v34 }
 0x7ef   :  { %v862_v59 = vadd.f32 %v858_v56, %v5227_v2  ;;  %v4733_v2 = vld [vmem:[#allocation2 + $0x210] ss:$8 sps:$4 sm:$0xff]  }
 0x7f0   :  { %v860_v61 = vadd.f32 %v856_v57, %v5230_v3  ;;  %v4734_v3 = vld [vmem:[#allocation2 + $0x220] ss:$8 sps:$4 sm:$0xff]  }
 0x7f1   :  { %v899_v62 = vpack.c.bf16 %v862_v59, %v861_v58 }
 0x7f2   :  { %v898_v63 = vpack.c.bf16 %v860_v61, %v859_v60 }
 0x7f3   :  { %v984_v6 = vsel %vm135_vm2, %v899_v62, 0 }
 0x7f4   :  { %4544 = vmatprep.mubr.msk.bf16.mxu1 %vm287_vm5, %v898_v63  ;;  %4548 = vmatprep.subr.bf16.mxu0 %v898_v63 }
 0x7f5   :  { %4545 = vmatmul.mubr.msk.bf16.vlgmr.msra.gmra.mrb[16].mxu1 %vm287_vm5, %v899_v62  ;;  %4549 = vmatpush3.bf16.msra.mxu0 %v898_v63 }
 0x7f6   :  { %4695 = vmatprep.subr.msk.bf16.mxu0 %vm135_vm2, %v899_v62  ;;  %4569 = vmatpush3.bf16.msra.mxu1 %v4735_v4 }
 0x7f7   :  { %4570 = vmatprep.subr.bf16.mxu1 %v4736_v7 }
 0x7f9   :  { %4551 = vmatpush3.bf16.msra.mxu0 %v984_v6 }
 0x7fa   :  { %4556 = vmatprep.subr.bf16.mxu0 %v4731_v0  ;;  %4571 = vmatpush3.bf16.msra.mxu1 %v4736_v7 }
 0x7fb   :  { %4572 = vmatprep.subr.bf16.mxu1 %v4737_v8 }
 0x7fc   :  { %4553 = vmatmul.mubr.msk.bf16.vlgmr.msra.gmra.mrb[24].mxu0 %vm128_vm3, %v5241_v10 }
 0x7fd   :  { %4557 = vmatpush3.bf16.msra.mxu0 %v4731_v0 }
 0x7fe   :  { %4558 = vmatprep.subr.bf16.mxu0 %v4732_v1  ;;  %4573 = vmatpush3.bf16.msra.mxu1 %v4737_v8  ;;  %v4743_v8 = vld [vmem:[#allocation2 + $0x320] ss:$8 sps:$4 sm:$0xff]  }
 0x7ff   :  { %4574 = vmatprep.subr.bf16.mxu1 %v4738_v5 }
 0x801   :  { %4559 = vmatpush3.bf16.msra.mxu0 %v4732_v1 }
 0x802   :  { %4560 = vmatprep.subr.bf16.mxu0 %v4733_v2  ;;  %4575 = vmatpush3.bf16.msra.mxu1 %v4738_v5 }
 0x803   :  { %4576 = vmatprep.subr.bf16.mxu1 %v4739_v11 }
 0x805   :  { %4561 = vmatpush3.bf16.msra.mxu0 %v4733_v2 }
 0x806   :  { %4562 = vmatprep.subr.bf16.mxu0 %v4734_v3  ;;  %4577 = vmatpush3.bf16.msra.mxu1 %v4739_v11  ;;  %v4744_v11 = vld [vmem:[#allocation2 + $0x330] ss:$8 sps:$4 sm:$0xff]  }
 0x807   :  { %4578 = vmatprep.subr.bf16.mxu1 %v4740_v12 }
 0x809   :  { %4563 = vmatpush3.bf16.msra.mxu0 %v4734_v3 }
 0x80a   :  { %4579 = vmatpush3.bf16.msra.mxu1 %v4740_v12  ;;  %v4745_v12 = vld [vmem:[#allocation2 + $0x340] ss:$8 sps:$4 sm:$0xff]  }
 0x80b   :  { %4580 = vmatprep.subr.bf16.mxu1 %v4741_v24 }
 0x80e   :  { %4581 = vmatpush3.bf16.msra.mxu1 %v4741_v24  ;;  %v4756_v24 = vld [vmem:[#allocation2 + $0x400] ss:$8 sps:$4 sm:$0xff]  }
 0x80f   :  { %4582 = vmatprep.subr.bf16.mxu1 %v4742_v25 }
 0x812   :  { %4583 = vmatpush3.bf16.msra.mxu1 %v4742_v25 }
 0x8c8   :  { %v4546_v14 = vpop.f32.mrb[16].mxu1 }
 0x8c9   :  { %v969_v15 = vpop.f32.mrb[17].mxu1  ;;  %v978_v54 = vadd.f32 %v4546_v14, %v904_v48  ;;  %v4746_v14 = vld [vmem:[#allocation2 + $0x350] ss:$8 sps:$4 sm:$0xff]  }
 0x8ca   :  { %v4547_v16 = vpop.f32.mrb[18].mxu1  ;;  %v970_v58 = vadd.f32 %v969_v15, %v904_v48  ;;  %v4747_v15 = vld [vmem:[#allocation2 + $0x360] ss:$8 sps:$4 sm:$0xff]  }
 0x8cb   :  { %v972_v17 = vpop.f32.mrb[19].mxu1  ;;  %v981_v61 = vadd.f32 %v4547_v16, %v904_v48  ;;  %v4748_v16 = vld [vmem:[#allocation2 + $0x370] ss:$8 sps:$4 sm:$0xff]  }
 0x8cc   :  { %v973_v0 = vadd.f32 %v972_v17, %v904_v48  ;;  %v4749_v17 = vld [vmem:[#allocation2 + $0x380] ss:$8 sps:$4 sm:$0xff]  }
 0x8cf   :  { %v4554_v18 = vpop.f32.mrb[24].mxu0 }
 0x8d0   :  { %v1020_v19 = vpop.f32.mrb[25].mxu0 }
 0x8d1   :  { %v4555_v20 = vpop.f32.mrb[26].mxu0 }
 0x8d2   :  { %v1036_v21 = vpack.c.bf16 %v4555_v20, %v4554_v18  ;;  %v1023_v22 = vpop.f32.mrb[27].mxu0  ;;  %v4750_v18 = vld [vmem:[#allocation2 + $0x390] ss:$8 sps:$4 sm:$0xff]   ;;  %v4752_v20 = vld [vmem:[#allocation2 + $0x3c0] ss:$8 sps:$4 sm:$0xff]  }
 0x8d3   :  { %v1035_v23 = vpack.c.bf16 %v1023_v22, %v1020_v19  ;;  %v4751_v19 = vld [vmem:[#allocation2 + $0x3b0] ss:$8 sps:$4 sm:$0xff]   ;;  %v4754_v22 = vld [vmem:[#allocation2 + $0x3e0] ss:$8 sps:$4 sm:$0xff]  }
 0x8d4   :  { %4616 = vmatprep.subr.bf16.mxu1 %v4751_v19 }
 0x8d5   :  { %4564 = vmatprep.mubr.msk.bf16.mxu0 %vm287_vm5, %v1035_v23  ;;  %v4755_v23 = vld [vmem:[#allocation2 + $0x3f0] ss:$8 sps:$4 sm:$0xff]  }
 0x8d6   :  { %4565 = vmatmul.mubr.msk.bf16.vlgmr.msra.gmra.mrb[28].mxu0 %vm287_vm5, %v1036_v21  ;;  %v4753_v21 = vld [vmem:[#allocation2 + $0x3d0] ss:$8 sps:$4 sm:$0xff]  }
 0x8d7   :  { %4592 = vmatprep.mubr.msk.bf16.mxu0 %vm128_vm3, %v5250_v40 }
 0x9a9   :  { %v4566_v28 = vpop.f32.mrb[28].mxu0 }
 0x9aa   :  { %v1115_v29 = vadd.f32 %v4566_v28, %v1041_v27  ;;  %v1106_v30 = vpop.f32.mrb[29].mxu0 }
 0x9ab   :  { %v1107_v31 = vadd.f32 %v1106_v30, %v1041_v27  ;;  %v4567_v32 = vpop.f32.mrb[30].mxu0  ;;  %v4757_v30 = vld [vmem:[#allocation2 + $0x410] ss:$8 sps:$4 sm:$0xff]  }
 0x9ac   :  { %v1118_v33 = vadd.f32 %v4567_v32, %v1041_v27  ;;  %v1109_v35 = vpop.f32.mrb[31].mxu0  ;;  %v1123_v37 = vmax.f32 %v1115_v29, 0.0  ;;  %v1253_v32 = vld [vmem:[#allocation2 + $0x3a0] sm:$0x1] }
 0x9ad   :  { %v1110_v36 = vadd.f32 %v1109_v35, %v1041_v27  ;;  %v1121_v39 = vmax.f32 %v1107_v31, 0.0  ;;  %v4758_v31 = vld [vmem:[#allocation2 + $0x420] ss:$8 sps:$4 sm:$0xff]  }
 0x9ae   :  { %v1124_v38 = vmax.f32 %v1118_v33, 0.0  ;;  %v1327_v33 = vunpack.c.l.bf16 %v1253_v32  ;;  %v4775_v32 = vld [vmem:[#allocation2 + $0x700] ss:$8 sps:$4 sm:$0xff]  }
 0x9af   :  { %v1122_v41 = vmax.f32 %v1110_v36, 0.0 }
 0x9b0   :  { %v1126_v42 = vpack.c.bf16 %v1124_v38, %v1123_v37  ;;  %v1331_v35 = vrot.slane %v1327_v33, %v5192_v34  ;;  %v4777_v33 = vld [vmem:[#allocation2 + $0x704] ss:$8 sps:$4 sm:$0xff]  }
 0x9b1   :  { %v1125_v9 = vpack.c.bf16 %v1122_v41, %v1121_v39 }
 0x9b3   :  { %4584 = vmatprep.mubr.bf16.mxu1 %v1125_v9 }
 0x9b4   :  { %4585 = vmatmul.mubr.bf16.vlgmr.msra.gmra.mrb[20].mxu1 %v1126_v42 }
 0x9b5   :  { %4617 = vmatpush3.bf16.msra.mxu1 %v4751_v19  ;;  %v4767_v19 = vld [vmem:[#allocation2 + $0x4d0] ss:$8 sps:$4 sm:$0xff]  }
 0x9b6   :  { %4618 = vmatprep.subr.bf16.mxu1 %v4752_v20 }
 0x9b9   :  { %4619 = vmatpush3.bf16.msra.mxu1 %v4752_v20  ;;  %v4768_v20 = vld [vmem:[#allocation2 + $0x4e0] ss:$8 sps:$4 sm:$0xff]  }
 0x9ba   :  { %4620 = vmatprep.subr.bf16.mxu1 %v4753_v21 }
 0x9bd   :  { %4621 = vmatpush3.bf16.msra.mxu1 %v4753_v21  ;;  %v4769_v21 = vld [vmem:[#allocation2 + $0x4f0] ss:$8 sps:$4 sm:$0xff]  }
 0x9be   :  { %4622 = vmatprep.subr.bf16.mxu1 %v4754_v22 }
 0x9c1   :  { %4623 = vmatpush3.bf16.msra.mxu1 %v4754_v22  ;;  %v4770_v22 = vld [vmem:[#allocation2 + $0x500] ss:$8 sps:$4 sm:$0xff]  }
 0x9c2   :  { %4624 = vmatprep.subr.bf16.mxu1 %v4755_v23 }
 0x9c5   :  { %4625 = vmatpush3.bf16.msra.mxu1 %v4755_v23  ;;  %v4771_v23 = vld [vmem:[#allocation2 + $0x510] ss:$8 sps:$4 sm:$0xff]  }
 0x9c6   :  { %4626 = vmatprep.subr.bf16.mxu1 %v4756_v24 }
 0x9c9   :  { %4627 = vmatpush3.bf16.msra.mxu1 %v4756_v24  ;;  %v4772_v24 = vld [vmem:[#allocation2 + $0x520] ss:$8 sps:$4 sm:$0xff]  }
 0x9ca   :  { %4628 = vmatprep.subr.bf16.mxu1 %v4757_v30 }
 0x9cd   :  { %4629 = vmatpush3.bf16.msra.mxu1 %v4757_v30  ;;  %v4773_v30 = vld [vmem:[#allocation2 + $0x530] ss:$8 sps:$4 sm:$0xff]  }
 0x9ce   :  { %4630 = vmatprep.subr.bf16.mxu1 %v4758_v31 }
 0x9d1   :  { %4631 = vmatpush3.bf16.msra.mxu1 %v4758_v31  ;;  %v4774_v31 = vld [vmem:[#allocation2 + $0x540] ss:$8 sps:$4 sm:$0xff]  }
 0x9d2   :  { %4664 = vmatprep.subr.bf16.mxu1 %v4767_v19 }
 0xa87   :  { %v4586_v49 = vpop.f32.mrb[20].mxu1 }
 0xa88   :  { %v1223_v50 = vadd.f32 %v4586_v49, %v1131_v47  ;;  %v1214_v51 = vpop.f32.mrb[21].mxu1 }
 0xa89   :  { %v1215_v52 = vadd.f32 %v1214_v51, %v1131_v47  ;;  %v4587_v53 = vpop.f32.mrb[22].mxu1 }
 0xa8a   :  { %v1231_v55 = vmax.f32 %v1223_v50, 0.0  ;;  %v1226_v56 = vadd.f32 %v4587_v53, %v1131_v47  ;;  %v1217_v57 = vpop.f32.mrb[23].mxu1  ;;  %v1270_v50 = vld [vmem:[#allocation2 + $0x430] sm:$0x1] }
 0xa8b   :  { %v1229_v59 = vmax.f32 %v1215_v52, 0.0  ;;  %v1218_v60 = vadd.f32 %v1217_v57, %v1131_v47  ;;  %v1435_v51 = vunpack.c.l.bf16 %v1270_v50 }
 0xa8c   :  { %v5272_v62 = vadd.f32 %v1231_v55, %v978_v54  ;;  %v1232_v63 = vmax.f32 %v1226_v56, 0.0 }
 0xa8d   :  { %v5274_v6 = vadd.f32 %v1229_v59, %v970_v58  ;;  %v1230_v1 = vmax.f32 %v1218_v60, 0.0  ;;  %v1439_v52 = vrot.slane %v1435_v51, %v5192_v34 }
 0xa8e   :  { %v5276_v2 = vadd.f32 %v1232_v63, %v981_v61 }
 0xa8f   :  { %v5278_v3 = vadd.f32 %v1230_v1, %v973_v0 }
 0xa90   :  { %v1272_v7 = vpack.c.bf16 %v5276_v2, %v5272_v62 }
 0xa91   :  { %v1271_v4 = vpack.c.bf16 %v5278_v3, %v5274_v6 }
 0xa92   :  { %v1274_v5 = vsel %vm135_vm2, %v1272_v7, 0 }
 0xa93   :  { %4588 = vmatprep.subr.bf16.mxu0 %v1271_v4 }
 0xa94   :  { %4589 = vmatpush3.bf16.msra.mxu0 %v1271_v4 }
 0xa95   :  { %4696 = vmatprep.subr.msk.bf16.mxu0 %vm135_vm2, %v1272_v7 }
 0xa98   :  { %4591 = vmatpush3.bf16.msra.mxu0 %v1274_v5 }
 0xa99   :  { %4596 = vmatprep.subr.bf16.mxu0 %v4743_v8 }
 0xa9b   :  { %4593 = vmatmul.mubr.msk.bf16.vlgmr.msra.gmra.mrb[32].mxu0 %vm128_vm3, %v5241_v10 }
 0xa9c   :  { %4597 = vmatpush3.bf16.msra.mxu0 %v4743_v8 }
 0xa9d   :  { %4598 = vmatprep.subr.bf16.mxu0 %v4744_v11 }
 0xaa0   :  { %4599 = vmatpush3.bf16.msra.mxu0 %v4744_v11 }
 0xaa1   :  { %4600 = vmatprep.subr.bf16.mxu0 %v4745_v12 }
 0xaa4   :  { %4601 = vmatpush3.bf16.msra.mxu0 %v4745_v12 }
 0xaa5   :  { %4602 = vmatprep.subr.bf16.mxu0 %v4746_v14 }
 0xaa8   :  { %4603 = vmatpush3.bf16.msra.mxu0 %v4746_v14  ;;  %v4762_v14 = vld [vmem:[#allocation2 + $0x470] ss:$8 sps:$4 sm:$0xff]  }
 0xaa9   :  { %4604 = vmatprep.subr.bf16.mxu0 %v4747_v15 }
 0xaac   :  { %4605 = vmatpush3.bf16.msra.mxu0 %v4747_v15  ;;  %v4763_v15 = vld [vmem:[#allocation2 + $0x480] ss:$8 sps:$4 sm:$0xff]  }
 0xaad   :  { %4606 = vmatprep.subr.bf16.mxu0 %v4748_v16 }
 0xab0   :  { %4607 = vmatpush3.bf16.msra.mxu0 %v4748_v16  ;;  %v4764_v16 = vld [vmem:[#allocation2 + $0x490] ss:$8 sps:$4 sm:$0xff]  }
 0xab1   :  { %4608 = vmatprep.subr.bf16.mxu0 %v4749_v17 }
 0xab4   :  { %4609 = vmatpush3.bf16.msra.mxu0 %v4749_v17  ;;  %v4765_v17 = vld [vmem:[#allocation2 + $0x4a0] ss:$8 sps:$4 sm:$0xff]  }
 0xab5   :  { %4610 = vmatprep.subr.bf16.mxu0 %v4750_v18 }
 0xab8   :  { %4611 = vmatpush3.bf16.msra.mxu0 %v4750_v18  ;;  %v4766_v18 = vld [vmem:[#allocation2 + $0x4b0] ss:$8 sps:$4 sm:$0xff]  }
 0xb6e   :  { %v4594_v25 = vpop.f32.mrb[32].mxu0 }
 0xb6f   :  { %v1310_v26 = vpop.f32.mrb[33].mxu0 }
 0xb70   :  { %v4595_v13 = vpop.f32.mrb[34].mxu0 }
 0xb71   :  { %v1326_v27 = vpack.c.bf16 %v4595_v13, %v4594_v25  ;;  %v1313_v28 = vpop.f32.mrb[35].mxu0 }
 0xb72   :  { %v1325_v29 = vpack.c.bf16 %v1313_v28, %v1310_v26 }
 0xb74   :  { %4612 = vmatprep.mubr.bf16.mxu0 %v1325_v29 }
 0xb75   :  { %4613 = vmatmul.mubr.bf16.vlgmr.msra.gmra.mrb[36].mxu0 %v1326_v27 }
 0xb76   :  { %4640 = vmatprep.mubr.msk.bf16.mxu0 %vm128_vm3, %v5250_v40 }
 0xc48   :  { %v4614_v36 = vpop.f32.mrb[36].mxu0 }
 0xc49   :  { %v1423_v37 = vadd.f32 %v4614_v36, %v1331_v35  ;;  %v1414_v38 = vpop.f32.mrb[37].mxu0  ;;  %v4778_v36 = vld [vmem:[#allocation2 + $0x710] ss:$8 sps:$4 sm:$0xff]  }
 0xc4a   :  { %v1415_v39 = vadd.f32 %v1414_v38, %v1331_v35  ;;  %v4615_v41 = vpop.f32.mrb[38].mxu0  ;;  %v4781_v38 = vld [vmem:[#allocation2 + $0x720] ss:$8 sps:$4 sm:$0xff]  }
 0xc4b   :  { %v1426_v42 = vadd.f32 %v4615_v41, %v1331_v35  ;;  %v1417_v9 = vpop.f32.mrb[39].mxu0  ;;  %v1431_v44 = vmax.f32 %v1423_v37, 0.0  ;;  %v4783_v37 = vld [vmem:[#allocation2 + $0x724] ss:$8 sps:$4 sm:$0xff]   ;;  %v4784_v41 = vld [vmem:[#allocation2 + $0x730] ss:$8 sps:$4 sm:$0xff]  }
 0xc4c   :  { %v1418_v43 = vadd.f32 %v1417_v9, %v1331_v35  ;;  %v1429_v46 = vmax.f32 %v1415_v39, 0.0  ;;  %v4780_v35 = vld [vmem:[#allocation2 + $0x714] ss:$8 sps:$4 sm:$0xff]   ;;  %v4787_v9 = vld [vmem:[#allocation2 + $0x740] ss:$8 sps:$4 sm:$0xff]  }
 0xc4d   :  { %v1432_v45 = vmax.f32 %v1426_v42, 0.0  ;;  %v4786_v39 = vld [vmem:[#allocation2 + $0x734] ss:$8 sps:$4 sm:$0xff]   ;;  %v4789_v42 = vld [vmem:[#allocation2 + $0x744] ss:$8 sps:$4 sm:$0xff]  }
 0xc4e   :  { %v1430_v47 = vmax.f32 %v1418_v43, 0.0  ;;  %v1561_v43 = vld [vmem:[#allocation2 + $0x4c0] sm:$0x1] }
 0xc4f   :  { %v1434_v48 = vpack.c.bf16 %v1432_v45, %v1431_v44  ;;  %v1635_v44 = vunpack.c.l.bf16 %v1561_v43  ;;  %v4825_v43 = vld [vmem:[#allocation2 + $0x5f4] ss:$8 sps:$4 sm:$0xff]  }
 0xc50   :  { %v1433_v49 = vpack.c.bf16 %v1430_v47, %v1429_v46 }
 0xc51   :  { %v1639_v45 = vrot.slane %v1635_v44, %v5192_v34  ;;  %v4828_v44 = vld [vmem:[#allocation2 + $0x604] ss:$8 sps:$4 sm:$0xff]  }
 0xc52   :  { %4632 = vmatprep.mubr.bf16.mxu1 %v1433_v49 }
 0xc53   :  { %4633 = vmatmul.mubr.bf16.vlgmr.msra.gmra.mrb[24].mxu1 %v1434_v48 }
 0xc54   :  { %4665 = vmatpush3.bf16.msra.mxu1 %v4767_v19 }
 0xc55   :  { %4666 = vmatprep.subr.bf16.mxu1 %v4768_v20 }
 0xc58   :  { %4667 = vmatpush3.bf16.msra.mxu1 %v4768_v20 }
 0xc59   :  { %4668 = vmatprep.subr.bf16.mxu1 %v4769_v21 }
 0xc5c   :  { %4669 = vmatpush3.bf16.msra.mxu1 %v4769_v21 }
 0xc5d   :  { %4670 = vmatprep.subr.bf16.mxu1 %v4770_v22 }
 0xc60   :  { %4671 = vmatpush3.bf16.msra.mxu1 %v4770_v22 }
 0xc61   :  { %4672 = vmatprep.subr.bf16.mxu1 %v4771_v23 }
 0xc64   :  { %4673 = vmatpush3.bf16.msra.mxu1 %v4771_v23 }
 0xc65   :  { %4674 = vmatprep.subr.bf16.mxu1 %v4772_v24 }
 0xc68   :  { %4675 = vmatpush3.bf16.msra.mxu1 %v4772_v24 }
 0xc69   :  { %4676 = vmatprep.subr.bf16.mxu1 %v4773_v30 }
 0xc6c   :  { %4677 = vmatpush3.bf16.msra.mxu1 %v4773_v30 }
 0xc6d   :  { %4678 = vmatprep.subr.bf16.mxu1 %v4774_v31 }
 0xc70   :  { %4679 = vmatpush3.bf16.msra.mxu1 %v4774_v31  ;;  %v4805_v31 = vld [vmem:[#allocation2 + $0x580] ss:$8 sps:$4 sm:$0xff]  }
 0xd26   :  { %v4634_v53 = vpop.f32.mrb[24].mxu1 }
 0xd27   :  { %v1522_v54 = vpop.f32.mrb[25].mxu1  ;;  %v1531_v55 = vadd.f32 %v4634_v53, %v1439_v52 }
 0xd28   :  { %v1523_v56 = vadd.f32 %v1522_v54, %v1439_v52  ;;  %v4635_v57 = vpop.f32.mrb[26].mxu1 }
 0xd29   :  { %v1534_v58 = vadd.f32 %v4635_v57, %v1439_v52  ;;  %v1525_v59 = vpop.f32.mrb[27].mxu1  ;;  %v1539_v0 = vmax.f32 %v1531_v55, 0.0 }
 0xd2a   :  { %v1537_v60 = vmax.f32 %v1523_v56, 0.0  ;;  %v1526_v61 = vadd.f32 %v1525_v59, %v1439_v52 }
 0xd2b   :  { %v1540_v63 = vmax.f32 %v1534_v58, 0.0  ;;  %v5302_v5 = vadd.f32 %v1539_v0, %v5272_v62  ;;  %v4761_v62 = vld [vmem:[#allocation2 + $0x460] ss:$8 sps:$4 sm:$0xff]  }
 0xd2c   :  { %v1538_v1 = vmax.f32 %v1526_v61, 0.0  ;;  %v5293_v4 = vadd.f32 %v1537_v60, %v5274_v6  ;;  %v4759_v6 = vld [vmem:[#allocation2 + $0x440] ss:$8 sps:$4 sm:$0xff]   ;;  %v4792_v60 = vld [vmem:[#allocation2 + $0x754] ss:$8 sps:$4 sm:$0xff]  }
 0xd2d   :  { %v5296_v7 = vadd.f32 %v1540_v63, %v5276_v2  ;;  %v4790_v61 = vld [vmem:[#allocation2 + $0x750] ss:$8 sps:$4 sm:$0xff]   ;;  %v4795_v63 = vld [vmem:[#allocation2 + $0x764] ss:$8 sps:$4 sm:$0xff]   ;;  %v4793_v0 = vld [vmem:[#allocation2 + $0x760] ss:$8 sps:$4 sm:$0xff]  }
 0xd2e   :  { %v5299_v8 = vadd.f32 %v1538_v1, %v5278_v3  ;;  %v4760_v3 = vld [vmem:[#allocation2 + $0x450] ss:$8 sps:$4 sm:$0xff]   ;;  %v4798_v1 = vld [vmem:[#allocation2 + $0x774] ss:$8 sps:$4 sm:$0xff]  }
 0xd2f   :  { %v1580_v12 = vpack.c.bf16 %v5296_v7, %v5302_v5 }
 0xd30   :  { %v1579_v11 = vpack.c.bf16 %v5299_v8, %v5293_v4 }
 0xd31   :  { %v1582_v2 = vsel %vm135_vm2, %v1580_v12, 0 }
 0xd32   :  { %4636 = vmatprep.subr.bf16.mxu0 %v1579_v11 }
 0xd33   :  { %4637 = vmatpush3.bf16.msra.mxu0 %v1579_v11  ;;  %v4796_v11 = vld [vmem:[#allocation2 + $0x770] ss:$8 sps:$4 sm:$0xff]  }
 0xd34   :  { %4697 = vmatprep.subr.msk.bf16.mxu0 %vm135_vm2, %v1580_v12  ;;  %v5135_v12 = vmov 0  }
 0xd37   :  { %4639 = vmatpush3.bf16.msra.mxu0 %v1582_v2 }
 0xd38   :  { %4644 = vmatprep.subr.bf16.mxu0 %v4759_v6 }
 0xd3a   :  { %4641 = vmatmul.mubr.msk.bf16.vlgmr.msra.gmra.mrb[40].mxu0 %vm128_vm3, %v5241_v10 }
 0xd3b   :  { %4645 = vmatpush3.bf16.msra.mxu0 %v4759_v6  ;;  %v1578_v6 = vld [vmem:[#allocation2 + $0x550] sm:$0x1] }
 0xd3c   :  { %4646 = vmatprep.subr.bf16.mxu0 %v4760_v3  ;;  %v1743_v2 = vunpack.c.l.bf16 %v1578_v6  ;;  %v4861_v6 = vld [vmem:[#allocation2 + $0x6b4] ss:$8 sps:$4 sm:$0xff]  }
 0xd3f   :  { %4647 = vmatpush3.bf16.msra.mxu0 %v4760_v3  ;;  %v1747_v3 = vrot.slane %v1743_v2, %v5192_v34  ;;  %v4859_v2 = vld [vmem:[#allocation2 + $0x6b0] ss:$8 sps:$4 sm:$0xff]  }
 0xd40   :  { %4648 = vmatprep.subr.bf16.mxu0 %v4761_v62 }
 0xd43   :  { %4649 = vmatpush3.bf16.msra.mxu0 %v4761_v62 }
 0xd44   :  { %4650 = vmatprep.subr.bf16.mxu0 %v4762_v14 }
 0xd47   :  { %4651 = vmatpush3.bf16.msra.mxu0 %v4762_v14 }
 0xd48   :  { %4652 = vmatprep.subr.bf16.mxu0 %v4763_v15 }
 0xd4b   :  { %4653 = vmatpush3.bf16.msra.mxu0 %v4763_v15 }
 0xd4c   :  { %4654 = vmatprep.subr.bf16.mxu0 %v4764_v16 }
 0xd4f   :  { %4655 = vmatpush3.bf16.msra.mxu0 %v4764_v16 }
 0xd50   :  { %4656 = vmatprep.subr.bf16.mxu0 %v4765_v17 }
 0xd53   :  { %4657 = vmatpush3.bf16.msra.mxu0 %v4765_v17 }
 0xd54   :  { %4658 = vmatprep.subr.bf16.mxu0 %v4766_v18 }
 0xd57   :  { %4659 = vmatpush3.bf16.msra.mxu0 %v4766_v18 }
 0xd58   :  { %2012 = vmatprep.subr.bf16.mxu0 %v4777_v33  ;;  %v4808_v33 = vld [vmem:[#allocation2 + $0x590] ss:$8 sps:$4 sm:$0xff]  }
 0xe0d   :  { %v4642_v25 = vpop.f32.mrb[40].mxu0 }
 0xe0e   :  { %v1618_v26 = vpop.f32.mrb[41].mxu0 }
 0xe0f   :  { %v4643_v13 = vpop.f32.mrb[42].mxu0 }
 0xe10   :  { %v1634_v27 = vpack.c.bf16 %v4643_v13, %v4642_v25  ;;  %v1621_v28 = vpop.f32.mrb[43].mxu0 }
 0xe11   :  { %v1633_v29 = vpack.c.bf16 %v1621_v28, %v1618_v26 }
 0xe13   :  { %4660 = vmatprep.mubr.bf16.mxu0 %v1633_v29  ;;  %v4801_v29 = vld [vmem:[#allocation2 + $0x564] ss:$8 sps:$4 sm:$0xff]  }
 0xe14   :  { %4661 = vmatmul.mubr.bf16.vlgmr.msra.gmra.mrb[44].mxu0 %v1634_v27 }
 0xe15   :  { %2013 = vmatpush1.bf16.msra.mxu0 %v4775_v32  ;;  %2044 = vmatprep.mubr.bf16.mxu0 %v5135_v12  ;;  %v4810_v32 = vld [vmem:[#allocation2 + $0x594] ss:$8 sps:$4 sm:$0xff]  }
 0xe16   :  { %2014 = vmatprep.subr.bf16.mxu0 %v4780_v35  ;;  %v4813_v35 = vld [vmem:[#allocation2 + $0x5a4] ss:$8 sps:$4 sm:$0xff]  }
 0xe19   :  { %2015 = vmatpush1.bf16.msra.mxu0 %v4778_v36  ;;  %v4811_v36 = vld [vmem:[#allocation2 + $0x5a0] ss:$8 sps:$4 sm:$0xff]  }
 0xe1a   :  { %2016 = vmatprep.subr.bf16.mxu0 %v4783_v37  ;;  %v4816_v37 = vld [vmem:[#allocation2 + $0x5b4] ss:$8 sps:$4 sm:$0xff]  }
 0xe1d   :  { %2017 = vmatpush1.bf16.msra.mxu0 %v4781_v38  ;;  %v4817_v38 = vld [vmem:[#allocation2 + $0x5c0] ss:$8 sps:$4 sm:$0xff]  }
 0xe1e   :  { %2018 = vmatprep.subr.bf16.mxu0 %v4786_v39  ;;  %v4819_v39 = vld [vmem:[#allocation2 + $0x5c4] ss:$8 sps:$4 sm:$0xff]  }
 0xe21   :  { %2019 = vmatpush1.bf16.msra.mxu0 %v4784_v41  ;;  %v4822_v41 = vld [vmem:[#allocation2 + $0x5d4] ss:$8 sps:$4 sm:$0xff]  }
 0xe22   :  { %2020 = vmatprep.subr.bf16.mxu0 %v4789_v42  ;;  %v4820_v42 = vld [vmem:[#allocation2 + $0x5d0] ss:$8 sps:$4 sm:$0xff]  }
 0xe25   :  { %2021 = vmatpush1.bf16.msra.mxu0 %v4787_v9  ;;  %v4823_v9 = vld [vmem:[#allocation2 + $0x5f0] ss:$8 sps:$4 sm:$0xff]  }
 0xe26   :  { %2022 = vmatprep.subr.bf16.mxu0 %v4792_v60  ;;  %v4852_v60 = vld [vmem:[#allocation2 + $0x684] ss:$8 sps:$4 sm:$0xff]  }
 0xe29   :  { %2023 = vmatpush1.bf16.msra.mxu0 %v4790_v61  ;;  %v4850_v61 = vld [vmem:[#allocation2 + $0x680] ss:$8 sps:$4 sm:$0xff]  }
 0xe2a   :  { %2024 = vmatprep.subr.bf16.mxu0 %v4795_v63  ;;  %v4855_v63 = vld [vmem:[#allocation2 + $0x694] ss:$8 sps:$4 sm:$0xff]  }
 0xe2d   :  { %2025 = vmatpush1.bf16.msra.mxu0 %v4793_v0  ;;  %v4853_v0 = vld [vmem:[#allocation2 + $0x690] ss:$8 sps:$4 sm:$0xff]  }
 0xe2e   :  { %2026 = vmatprep.subr.bf16.mxu0 %v4798_v1  ;;  %v4858_v1 = vld [vmem:[#allocation2 + $0x6a4] ss:$8 sps:$4 sm:$0xff]  }
 0xe31   :  { %2027 = vmatpush1.bf16.msra.mxu0 %v4796_v11  ;;  %v4856_v11 = vld [vmem:[#allocation2 + $0x6a0] ss:$8 sps:$4 sm:$0xff]  }
 0xe32   :  { %2444 = vmatprep.subr.bf16.mxu0 %v4825_v43 }
 0xee7   :  { %v4662_v46 = vpop.f32.mrb[44].mxu0 }
 0xee8   :  { %v1731_v47 = vadd.f32 %v4662_v46, %v1639_v45  ;;  %v1722_v48 = vpop.f32.mrb[45].mxu0  ;;  %v4831_v46 = vld [vmem:[#allocation2 + $0x614] ss:$8 sps:$4 sm:$0xff]  }
 0xee9   :  { %v1723_v49 = vadd.f32 %v1722_v48, %v1639_v45  ;;  %v4663_v50 = vpop.f32.mrb[46].mxu0  ;;  %v4834_v48 = vld [vmem:[#allocation2 + $0x624] ss:$8 sps:$4 sm:$0xff]  }
 0xeea   :  { %v1734_v51 = vadd.f32 %v4663_v50, %v1639_v45  ;;  %v1725_v52 = vpop.f32.mrb[47].mxu0  ;;  %v1739_v54 = vmax.f32 %v1731_v47, 0.0  ;;  %v4829_v47 = vld [vmem:[#allocation2 + $0x610] ss:$8 sps:$4 sm:$0xff]   ;;  %v4837_v50 = vld [vmem:[#allocation2 + $0x634] ss:$8 sps:$4 sm:$0xff]  }
 0xeeb   :  { %v1726_v53 = vadd.f32 %v1725_v52, %v1639_v45  ;;  %v1737_v56 = vmax.f32 %v1723_v49, 0.0  ;;  %v4826_v45 = vld [vmem:[#allocation2 + $0x600] ss:$8 sps:$4 sm:$0xff]   ;;  %v4840_v52 = vld [vmem:[#allocation2 + $0x644] ss:$8 sps:$4 sm:$0xff]  }
 0xeec   :  { %v1740_v55 = vmax.f32 %v1734_v51, 0.0  ;;  %v4832_v49 = vld [vmem:[#allocation2 + $0x620] ss:$8 sps:$4 sm:$0xff]   ;;  %v4835_v51 = vld [vmem:[#allocation2 + $0x630] ss:$8 sps:$4 sm:$0xff]  }
 0xeed   :  { %v1738_v57 = vmax.f32 %v1726_v53, 0.0  ;;  %v4838_v53 = vld [vmem:[#allocation2 + $0x640] ss:$8 sps:$4 sm:$0xff]  }
 0xeee   :  { %v1742_v58 = vpack.c.bf16 %v1740_v55, %v1739_v54  ;;  %v4843_v54 = vld [vmem:[#allocation2 + $0x654] ss:$8 sps:$4 sm:$0xff]   ;;  %v4841_v55 = vld [vmem:[#allocation2 + $0x650] ss:$8 sps:$4 sm:$0xff]  }
 0xeef   :  { %v1741_v59 = vpack.c.bf16 %v1738_v57, %v1737_v56  ;;  %v4846_v56 = vld [vmem:[#allocation2 + $0x664] ss:$8 sps:$4 sm:$0xff]   ;;  %v4844_v57 = vld [vmem:[#allocation2 + $0x660] ss:$8 sps:$4 sm:$0xff]  }
 0xef1   :  { %4680 = vmatprep.mubr.bf16.mxu1 %v1741_v59  ;;  %v4847_v59 = vld [vmem:[#allocation2 + $0x670] ss:$8 sps:$4 sm:$0xff]  }
 0xef2   :  { %4681 = vmatmul.mubr.bf16.vlgmr.msra.gmra.mrb[28].mxu1 %v1742_v58  ;;  %v4849_v58 = vld [vmem:[#allocation2 + $0x674] ss:$8 sps:$4 sm:$0xff]  }
 0xef3   :  { %4688 = vmatprep.mubr.msk.bf16.mxu1 %vm128_vm3, %v5250_v40 }
 0xfc5   :  { %v4682_v40 = vpop.f32.mrb[28].mxu1 }
 0xfc6   :  { %v1839_v62 = vadd.f32 %v4682_v40, %v1747_v3  ;;  %v1830_v14 = vpop.f32.mrb[29].mxu1  ;;  %v4862_v40 = vld [vmem:[#allocation2 + $0x6c0] ss:$8 sps:$4 sm:$0xff]  }
 0xfc7   :  { %v1831_v15 = vadd.f32 %v1830_v14, %v1747_v3  ;;  %v4683_v16 = vpop.f32.mrb[30].mxu1 }
 0xfc8   :  { %v1847_v17 = vmax.f32 %v1839_v62, 0.0  ;;  %v1842_v18 = vadd.f32 %v4683_v16, %v1747_v3  ;;  %v1833_v19 = vpop.f32.mrb[31].mxu1 }
 0xfc9   :  { %v1845_v20 = vmax.f32 %v1831_v15, 0.0  ;;  %v1834_v21 = vadd.f32 %v1833_v19, %v1747_v3  ;;  %v4864_v3 = vld [vmem:[#allocation2 + $0x6c4] ss:$8 sps:$4 sm:$0xff]  }
 0xfca   :  { %v1848_v22 = vmax.f32 %v1842_v18, 0.0  ;;  %v1851_v24 = vadd.f32 %v1847_v17, %v5302_v5  ;;  %v4799_v5 = vld [vmem:[#allocation2 + $0x560] ss:$8 sps:$4 sm:$0xff]  }
 0xfcb   :  { %v1846_v23 = vmax.f32 %v1834_v21, 0.0  ;;  %v1849_v26 = vadd.f32 %v1845_v20, %v5293_v4  ;;  %v4802_v4 = vld [vmem:[#allocation2 + $0x570] ss:$8 sps:$4 sm:$0xff]  }
 0xfcc   :  { %v1852_v25 = vadd.f32 %v1848_v22, %v5296_v7  ;;  %v4804_v7 = vld [vmem:[#allocation2 + $0x574] ss:$8 sps:$4 sm:$0xff]  }
 0xfcd   :  { %v1850_v13 = vadd.f32 %v1846_v23, %v5299_v8  ;;  %v4807_v8 = vld [vmem:[#allocation2 + $0x584] ss:$8 sps:$4 sm:$0xff]  }
 0xfce   :  { %v1921_v27 = vpack.c.bf16 %v1852_v25, %v1851_v24 }
 0xfcf   :  { %v1920_v28 = vpack.c.bf16 %v1850_v13, %v1849_v26  ;;  %v4867_v13 = vld [vmem:[#allocation2 + $0x6d4] ss:$8 sps:$4 sm:$0xff]  }
 0xfd0   :  { %v2066_v30 = vsel %vm135_vm2, %v1921_v27, 0 }
 0xfd1   :  { %2045 = vmatmul.mubr.bf16.vlgmr.msra.gmra.mrb[48].mxu0 %v1920_v28  ;;  %4684 = vmatprep.subr.bf16.mxu1 %v1920_v28 }
 0xfd2   :  { %4685 = vmatpush3.bf16.msra.mxu1 %v1920_v28  ;;  %2054 = vmatprep.mubr.bf16.mxu0 %v5135_v12  ;;  %v4870_v28 = vld [vmem:[#allocation2 + $0x6e4] ss:$8 sps:$4 sm:$0xff]  }
 0xfd3   :  { %4698 = vmatprep.subr.msk.bf16.mxu1 %vm135_vm2, %v1921_v27  ;;  %2445 = vmatpush1.bf16.msra.mxu0 %v4823_v9 }
 0xfd4   :  { %2446 = vmatprep.subr.bf16.mxu0 %v4828_v44 }
 0xfd6   :  { %4687 = vmatpush3.bf16.msra.mxu1 %v2066_v30  ;;  %v1869_v30 = vld [vmem:[#allocation2 + $0x5e0] sm:$0x11] }
 0xfd7   :  { %2209 = vmatprep.subr.bf16.mxu1 %v4801_v29  ;;  %2447 = vmatpush1.bf16.msra.mxu0 %v4826_v45  ;;  %v4868_v29 = vld [vmem:[#allocation2 + $0x6e0] ss:$8 sps:$4 sm:$0xff]  }
 0xfd8   :  { %2448 = vmatprep.subr.bf16.mxu0 %v4831_v46 }
 0xfd9   :  { %2055 = vmatmul.mubr.bf16.gmra.mrb[52].mxu0 %v1921_v27  ;;  %4689 = vmatmul.mubr.msk.bf16.vlgmr.msra.gmra.mrb[32].mxu1 %vm128_vm3, %v5241_v10  ;;  %v4814_v10 = vld [vmem:[#allocation2 + $0x5b0] ss:$8 sps:$4 sm:$0xff]  }
 0xfda   :  { %2210 = vmatpush1.bf16.msra.mxu1 %v4799_v5  ;;  %2241 = vmatprep.mubr.bf16.mxu1 %v5135_v12  ;;  %v4865_v27 = vld [vmem:[#allocation2 + $0x6d0] ss:$8 sps:$4 sm:$0xff]   ;;  %v2119_v5 = vunpack.c.l.bf16 %v1869_v30 }
 0xfdb   :  { %2211 = vmatprep.subr.bf16.mxu1 %v4804_v7  ;;  %2449 = vmatpush1.bf16.msra.mxu0 %v4829_v47  ;;  %v2120_v7 = vunpack.c.h.bf16 %v1869_v30 }
 0xfdc   :  { %2450 = vmatprep.subr.bf16.mxu0 %v4834_v48 }
 0xfde   :  { %2212 = vmatpush1.bf16.msra.mxu1 %v4802_v4  ;;  %v2124_v4 = vrot.slane %v2119_v5, %v5192_v34 }
 0xfdf   :  { %2213 = vmatprep.subr.bf16.mxu1 %v4807_v8  ;;  %2451 = vmatpush1.bf16.msra.mxu0 %v4832_v49  ;;  %v2128_v8 = vrot.slane %v2120_v7, %v5192_v34 }
 0xfe0   :  { %2452 = vmatprep.subr.bf16.mxu0 %v4837_v50 }
 0xfe2   :  { %2214 = vmatpush1.bf16.msra.mxu1 %v4805_v31 }
 0xfe3   :  { %2215 = vmatprep.subr.bf16.mxu1 %v4810_v32  ;;  %2453 = vmatpush1.bf16.msra.mxu0 %v4835_v51 }
 0xfe4   :  { %2454 = vmatprep.subr.bf16.mxu0 %v4840_v52 }
 0xfe6   :  { %2216 = vmatpush1.bf16.msra.mxu1 %v4808_v33 }
 0xfe7   :  { %2217 = vmatprep.subr.bf16.mxu1 %v4813_v35  ;;  %2455 = vmatpush1.bf16.msra.mxu0 %v4838_v53 }
 0xfe8   :  { %2456 = vmatprep.subr.bf16.mxu0 %v4843_v54 }
 0xfea   :  { %2218 = vmatpush1.bf16.msra.mxu1 %v4811_v36 }
 0xfeb   :  { %2219 = vmatprep.subr.bf16.mxu1 %v4816_v37  ;;  %2457 = vmatpush1.bf16.msra.mxu0 %v4841_v55 }
 0xfec   :  { %2458 = vmatprep.subr.bf16.mxu0 %v4846_v56 }
 0xfee   :  { %2220 = vmatpush1.bf16.msra.mxu1 %v4814_v10 }
 0xfef   :  { %2221 = vmatprep.subr.bf16.mxu1 %v4819_v39  ;;  %2459 = vmatpush1.bf16.msra.mxu0 %v4844_v57 }
 0xff0   :  { %2460 = vmatprep.subr.bf16.mxu0 %v4849_v58 }
 0xff2   :  { %2222 = vmatpush1.bf16.msra.mxu1 %v4817_v38 }
 0xff3   :  { %2223 = vmatprep.subr.bf16.mxu1 %v4822_v41  ;;  %2461 = vmatpush1.bf16.msra.mxu0 %v4847_v59  ;;  %v1902_v59 = vld [vmem:[#allocation2 + $0x6f0] sm:$0x11] }
 0xff4   :  { %2462 = vmatprep.subr.bf16.mxu0 %v4852_v60  ;;  %v1919_v60 = vld [vmem:[#allocation2 + $0x780] sm:$0x11] }
 0xff6   :  { %2224 = vmatpush1.bf16.msra.mxu1 %v4820_v42 }
 0xff7   :  { %2463 = vmatpush1.bf16.msra.mxu0 %v4850_v61  ;;  %v2274_v61 = vunpack.c.l.bf16 %v1902_v59 }
 0xff8   :  { %2464 = vmatprep.subr.bf16.mxu0 %v4855_v63  ;;  %v2275_v63 = vunpack.c.h.bf16 %v1902_v59  ;;  %v4882_v59 = vld [vmem:[#allocation2 + $0x7c4] ss:$8 sps:$4 sm:$0xff]  }
 0xffb   :  { %2465 = vmatpush1.bf16.msra.mxu0 %v4853_v0  ;;  %v1922_v0 = vunpack.c.l.bf16 %v1919_v60 }
 0xffc   :  { %2466 = vmatprep.subr.bf16.mxu0 %v4858_v1  ;;  %v1923_v1 = vunpack.c.h.bf16 %v1919_v60  ;;  %v5390_v60 = vld [vmem:[#allocation2 + $0x10] ss:$8 sps:$4 sm:$0x1f]  }
 0xfff   :  { %2467 = vmatpush1.bf16.msra.mxu0 %v4856_v11  ;;  %v2279_v11 = vrot.slane %v2274_v61, %v5192_v34  ;;  %v4880_v61 = vld [vmem:[#allocation2 + $0x7c0] ss:$8 sps:$4 sm:$0xff]  }
0x1000   :  { %2468 = vmatprep.subr.bf16.mxu0 %v4861_v6  ;;  %v2283_v6 = vrot.slane %v2275_v63, %v5192_v34  ;;  %v4885_v63 = vld [vmem:[#allocation2 + $0x7d4] ss:$8 sps:$4 sm:$0xff]  }
0x1003   :  { %2469 = vmatpush1.bf16.msra.mxu0 %v4859_v2  ;;  %v1927_v2 = vrot.slane %v1922_v0, %v5192_v34  ;;  %v4883_v0 = vld [vmem:[#allocation2 + $0x7d0] ss:$8 sps:$4 sm:$0xff]  }
0x1004   :  { %2470 = vmatprep.subr.bf16.mxu0 %v4864_v3  ;;  %v1931_v3 = vrot.slane %v1923_v1, %v5192_v34  ;;  %v4888_v1 = vld [vmem:[#allocation2 + $0x7e4] ss:$8 sps:$4 sm:$0xff]  }
0x1007   :  { %2471 = vmatpush1.bf16.msra.mxu0 %v4862_v40 }
0x1008   :  { %2472 = vmatprep.subr.bf16.mxu0 %v4867_v13 }
0x100b   :  { %2473 = vmatpush1.bf16.msra.mxu0 %v4865_v27 }
0x100c   :  { %2474 = vmatprep.subr.bf16.mxu0 %v4870_v28 }
0x100f   :  { %2475 = vmatpush1.bf16.msra.mxu0 %v4868_v29 }
0x10a4   :  { %v5327_v62 = vpop.f32.mrb[48].mxu0 }
0x10a5   :  { %v5329_v14 = vpop.f32.mrb[49].mxu0 }
0x10a6   :  { %v5331_v15 = vpop.f32.mrb[50].mxu0  ;;  %v2049_v28 = vadd.f32 %v5329_v14, %v1931_v3 }
0x10a7   :  { %v5333_v16 = vpop.f32.mrb[51].mxu0  ;;  %v2051_v5 = vadd.f32 %v5331_v15, %v1927_v2 }
0x10ac   :  { %v5335_v17 = vpop.f32.mrb[52].mxu0  ;;  %v4690_v18 = vpop.f32.mrb[32].mxu1 }
0x10ad   :  { %v5337_v19 = vpop.f32.mrb[53].mxu0  ;;  %v2102_v20 = vpop.f32.mrb[33].mxu1 }
0x10ae   :  { %v5339_v21 = vpop.f32.mrb[54].mxu0  ;;  %v4691_v22 = vpop.f32.mrb[34].mxu1 }
0x10af   :  { %v2118_v23 = vpack.c.bf16 %v4691_v22, %v4690_v18  ;;  %v5341_v24 = vpop.f32.mrb[55].mxu0  ;;  %v2105_v25 = vpop.f32.mrb[35].mxu1 }
0x10b0   :  { %v2117_v26 = vpack.c.bf16 %v2105_v25, %v2102_v20  ;;  %v2047_v25 = vadd.f32 %v5327_v62, %v1927_v2 }
0x10b2   :  { %2242 = vmatmul.mubr.bf16.vlgmr.msra.gmra.mrb[36].mxu1 %v2117_v26 }
0x10b3   :  { %2251 = vmatprep.mubr.bf16.mxu1 %v5135_v12 }
0x10ba   :  { %2252 = vmatmul.mubr.bf16.gmra.mrb[40].mxu1 %v2118_v23 }
0x10bb   :  { %2621 = vmatprep.mubr.bf16.mxu1 %v5135_v12 }
0x1185   :  { %v2243_v31 = vpop.f32.mrb[36].mxu1 }
0x1186   :  { %v2244_v32 = vadd.f32 %v2243_v31, %v2124_v4  ;;  %v2245_v33 = vpop.f32.mrb[37].mxu1 }
0x1187   :  { %v2246_v35 = vadd.f32 %v2245_v33, %v2128_v8  ;;  %v2247_v36 = vpop.f32.mrb[38].mxu1 }
0x1188   :  { %v2248_v37 = vadd.f32 %v2247_v36, %v2124_v4  ;;  %v2249_v10 = vpop.f32.mrb[39].mxu1  ;;  %v2262_v39 = vmax.f32 %v2244_v32, 0.0 }
0x1189   :  { %v2250_v38 = vadd.f32 %v2249_v10, %v2128_v8  ;;  %v2263_v42 = vmax.f32 %v2246_v35, 0.0 }
0x118a   :  { %v2264_v41 = vmax.f32 %v2248_v37, 0.0 }
0x118b   :  { %v2265_v9 = vmax.f32 %v2250_v38, 0.0  ;;  %v2057_v38 = vadd.f32 %v5335_v17, %v1927_v2 }
0x118c   :  { %v2270_v43 = vpack.c.bf16 %v2264_v41, %v2262_v39 }
0x118d   :  { %v2271_v44 = vpack.c.bf16 %v2265_v9, %v2263_v42  ;;  %v2253_v45 = vpop.f32.mrb[40].mxu1  ;;  %v2059_v9 = vadd.f32 %v5337_v19, %v1931_v3 }
0x118e   :  { %v2254_v46 = vadd.f32 %v2253_v45, %v2124_v4  ;;  %v2255_v47 = vpop.f32.mrb[41].mxu1  ;;  %v2061_v45 = vadd.f32 %v5339_v21, %v1927_v2  ;;  %v4873_v21 = vld [vmem:[#allocation2 + $0x794] ss:$8 sps:$4 sm:$0xff]   ;;  %v4889_v2 = vld [vmem:[#allocation2 + $0x7f0] ss:$8 sps:$4 sm:$0xff]  }
0x118f   :  { %v2256_v48 = vadd.f32 %v2255_v47, %v2128_v8  ;;  %v2257_v49 = vpop.f32.mrb[42].mxu1  ;;  %2476 = vmatprep.mubr.bf16.mxu0 %v2271_v44 }
0x1190   :  { %v2258_v50 = vadd.f32 %v2257_v49, %v2124_v4  ;;  %v2259_v51 = vpop.f32.mrb[43].mxu1  ;;  %2477 = vmatmul.mubr.bf16.vlgmr.msra.gmra.mrb[56].mxu0 %v2270_v43  ;;  %v2266_v53 = vmax.f32 %v2254_v46, 0.0 }
0x1191   :  { %v2260_v52 = vadd.f32 %v2259_v51, %v2128_v8  ;;  %v2267_v55 = vmax.f32 %v2256_v48, 0.0  ;;  %v2053_v8 = vadd.f32 %v5333_v16, %v1931_v3  ;;  %v2063_v48 = vadd.f32 %v5341_v24, %v1931_v3  ;;  %v4871_v24 = vld [vmem:[#allocation2 + $0x790] ss:$8 sps:$4 sm:$0xff]   ;;  %v4894_v3 = vld [vmem:[#allocation2 + $0x804] ss:$8 sps:$4 sm:$0xff]  }
0x1192   :  { %v2268_v54 = vmax.f32 %v2258_v50, 0.0 }
0x1193   :  { %v2269_v56 = vmax.f32 %v2260_v52, 0.0 }
0x1194   :  { %v2272_v57 = vpack.c.bf16 %v2268_v54, %v2266_v53  ;;  %v4876_v54 = vld [vmem:[#allocation2 + $0x7a4] ss:$8 sps:$4 sm:$0xff]  }
0x1195   :  { %v2273_v58 = vpack.c.bf16 %v2269_v56, %v2267_v55  ;;  %v5385_v55 = vld [vmem:[#allocation2] ss:$8 sps:$4 sm:$0xff]  }
0x1196   :  { %v4874_v56 = vld [vmem:[#allocation2 + $0x7a0] ss:$8 sps:$4 sm:$0xff]  }
0x1197   :  { %2486 = vmatprep.mubr.bf16.mxu0 %v2273_v58  ;;  %v4877_v58 = vld [vmem:[#allocation2 + $0x7b0] ss:$8 sps:$4 sm:$0xff]  }
0x1198   :  { %2487 = vmatmul.mubr.bf16.gmra.mrb[60].mxu0 %v2272_v57  ;;  %v4879_v57 = vld [vmem:[#allocation2 + $0x7b4] ss:$8 sps:$4 sm:$0xff]  }
0x1263   :  { %v2478_v40 = vpop.f32.mrb[56].mxu0 }
0x1264   :  { %v2479_v18 = vadd.f32 %v2478_v40, %v2279_v11  ;;  %v2480_v20 = vpop.f32.mrb[57].mxu0  ;;  %v4892_v40 = vld [vmem:[#allocation2 + $0x800] ss:$8 sps:$4 sm:$0xff]  }
0x1265   :  { %v2481_v22 = vadd.f32 %v2480_v20, %v2283_v6  ;;  %v2482_v23 = vpop.f32.mrb[58].mxu0  ;;  %v4895_v20 = vld [vmem:[#allocation2 + $0x810] ss:$8 sps:$4 sm:$0xff]  }
0x1266   :  { %v2497_v26 = vmax.f32 %v2479_v18, 0.0  ;;  %v2483_v13 = vadd.f32 %v2482_v23, %v2279_v11  ;;  %v2484_v27 = vpop.f32.mrb[59].mxu0  ;;  %v4897_v18 = vld [vmem:[#allocation2 + $0x814] ss:$8 sps:$4 sm:$0xff]   ;;  %v4898_v23 = vld [vmem:[#allocation2 + $0x820] ss:$8 sps:$4 sm:$0xff]  }
0x1267   :  { %v2498_v29 = vmax.f32 %v2481_v22, 0.0  ;;  %v2485_v30 = vadd.f32 %v2484_v27, %v2283_v6  ;;  %v4900_v22 = vld [vmem:[#allocation2 + $0x824] ss:$8 sps:$4 sm:$0xff]   ;;  %v4904_v27 = vld [vmem:[#allocation2 + $0x840] ss:$8 sps:$4 sm:$0xff]  }
0x1268   :  { %v5354_v7 = vadd.f32 %v2497_v26, %v2047_v25  ;;  %v2499_v4 = vmax.f32 %v2483_v13, 0.0  ;;  %v4903_v25 = vld [vmem:[#allocation2 + $0x834] ss:$8 sps:$4 sm:$0xff]   ;;  %v4901_v26 = vld [vmem:[#allocation2 + $0x830] ss:$8 sps:$4 sm:$0xff]  }
0x1269   :  { %v5357_v31 = vadd.f32 %v2498_v29, %v2049_v28  ;;  %v2500_v32 = vmax.f32 %v2485_v30, 0.0  ;;  %v4906_v13 = vld [vmem:[#allocation2 + $0x844] ss:$8 sps:$4 sm:$0xff]   ;;  %v4909_v28 = vld [vmem:[#allocation2 + $0x854] ss:$8 sps:$4 sm:$0xff]  }
0x126a   :  { %v5359_v33 = vadd.f32 %v2499_v4, %v2051_v5  ;;  %v4907_v29 = vld [vmem:[#allocation2 + $0x850] ss:$8 sps:$4 sm:$0xff]   ;;  %v4912_v30 = vld [vmem:[#allocation2 + $0x864] ss:$8 sps:$4 sm:$0xff]   ;;  %v4910_v5 = vld [vmem:[#allocation2 + $0x860] ss:$8 sps:$4 sm:$0xff]  }
0x126b   :  { %v5361_v62 = vadd.f32 %v2500_v32, %v2053_v8  ;;  %v2488_v35 = vpop.f32.mrb[60].mxu0  ;;  %v4915_v4 = vld [vmem:[#allocation2 + $0x874] ss:$8 sps:$4 sm:$0xff]   ;;  %v4913_v8 = vld [vmem:[#allocation2 + $0x870] ss:$8 sps:$4 sm:$0xff]  }
0x126c   :  { %v2489_v36 = vadd.f32 %v2488_v35, %v2279_v11  ;;  %v2490_v37 = vpop.f32.mrb[61].mxu0  ;;  %v2579_v16 = vpack.c.bf16 %v5359_v33, %v5354_v7  ;;  %v4918_v32 = vld [vmem:[#allocation2 + $0x884] ss:$8 sps:$4 sm:$0xff]   ;;  %v4916_v35 = vld [vmem:[#allocation2 + $0x880] ss:$8 sps:$4 sm:$0xff]  }
0x126d   :  { %v2491_v14 = vadd.f32 %v2490_v37, %v2283_v6  ;;  %v2492_v10 = vpop.f32.mrb[62].mxu0  ;;  %v2580_v15 = vpack.c.bf16 %v5361_v62, %v5357_v31  ;;  %v4921_v37 = vld [vmem:[#allocation2 + $0x8a4] ss:$8 sps:$4 sm:$0xff]  }
0x126e   :  { %v2501_v39 = vmax.f32 %v2489_v36, 0.0  ;;  %v2493_v41 = vadd.f32 %v2492_v10, %v2279_v11  ;;  %v2494_v42 = vpop.f32.mrb[63].mxu0  ;;  %v4886_v11 = vld [vmem:[#allocation2 + $0x7e0] ss:$8 sps:$4 sm:$0xff]   ;;  %3051 = vmatprep.subr.bf16.mxu0 %v4921_v37  ;;  %v4922_v10 = vld [vmem:[#allocation2 + $0x8b0] ss:$8 sps:$4 sm:$0xff]  }
0x126f   :  { %v2502_v43 = vmax.f32 %v2491_v14, 0.0  ;;  %v2495_v44 = vadd.f32 %v2494_v42, %v2283_v6  ;;  %2589 = vmatprep.subr.bf16.mxu1 %v2580_v15  ;;  %v4891_v6 = vld [vmem:[#allocation2 + $0x7f4] ss:$8 sps:$4 sm:$0xff]   ;;  %v4919_v36 = vld [vmem:[#allocation2 + $0x8a0] ss:$8 sps:$4 sm:$0xff]  }
0x1270   :  { %v5370_v46 = vadd.f32 %v2501_v39, %v2057_v38  ;;  %v2503_v47 = vmax.f32 %v2493_v41, 0.0  ;;  %2590 = vmatpush1.bf16.msra.mxu1 %v2579_v16  ;;  %v4924_v14 = vld [vmem:[#allocation2 + $0x8b4] ss:$8 sps:$4 sm:$0xff]   ;;  %3052 = vmatpush1.bf16.msra.mxu0 %v4919_v36  ;;  %v4927_v15 = vld [vmem:[#allocation2 + $0x8c4] ss:$8 sps:$4 sm:$0xff]  }
0x1271   :  { %v5373_v17 = vadd.f32 %v2502_v43, %v2059_v9  ;;  %v2504_v49 = vmax.f32 %v2495_v44, 0.0  ;;  %3053 = vmatprep.subr.bf16.mxu0 %v4924_v14  ;;  %v4925_v38 = vld [vmem:[#allocation2 + $0x8c0] ss:$8 sps:$4 sm:$0xff]   ;;  %v4930_v16 = vld [vmem:[#allocation2 + $0x8d4] ss:$8 sps:$4 sm:$0xff]  }
0x1272   :  { %v5375_v50 = vadd.f32 %v2503_v47, %v2061_v45  ;;  %v4928_v39 = vld [vmem:[#allocation2 + $0x8d0] ss:$8 sps:$4 sm:$0xff]   ;;  %v4933_v41 = vld [vmem:[#allocation2 + $0x8e4] ss:$8 sps:$4 sm:$0xff]   ;;  %v4931_v42 = vld [vmem:[#allocation2 + $0x8e0] ss:$8 sps:$4 sm:$0xff]  }
0x1273   :  { %v5377_v51 = vadd.f32 %v2504_v49, %v2063_v48  ;;  %v4936_v9 = vld [vmem:[#allocation2 + $0x8f4] ss:$8 sps:$4 sm:$0xff]   ;;  %v4934_v43 = vld [vmem:[#allocation2 + $0x8f0] ss:$8 sps:$4 sm:$0xff]   ;;  %v4939_v44 = vld [vmem:[#allocation2 + $0x904] ss:$8 sps:$4 sm:$0xff]  }
0x1274   :  { %v2581_v19 = vpack.c.bf16 %v5375_v50, %v5370_v46  ;;  %3054 = vmatpush1.bf16.msra.mxu0 %v4922_v10  ;;  %v4937_v45 = vld [vmem:[#allocation2 + $0x900] ss:$8 sps:$4 sm:$0xff]   ;;  %v4942_v47 = vld [vmem:[#allocation2 + $0x914] ss:$8 sps:$4 sm:$0xff]   ;;  %v4940_v48 = vld [vmem:[#allocation2 + $0x910] ss:$8 sps:$4 sm:$0xff]  }
0x1275   :  { %v2582_v52 = vpack.c.bf16 %v5377_v51, %v5373_v17  ;;  %3055 = vmatprep.subr.bf16.mxu0 %v4927_v15  ;;  %v4945_v49 = vld [vmem:[#allocation2 + $0x924] ss:$8 sps:$4 sm:$0xff]  }
0x1276   :  { %v2584_v53 = vsel %vm135_vm2, %v2581_v19, 0  ;;  %v4943_v19 = vld [vmem:[#allocation2 + $0x920] ss:$8 sps:$4 sm:$0xff]  }
0x1277   :  { %4140 = vmatprep.subr.msk.bf16.mxu1 %vm135_vm2, %v2582_v52  ;;  %v4948_v52 = vld [vmem:[#allocation2 + $0x934] ss:$8 sps:$4 sm:$0xff]  }
0x1278   :  { %2592 = vmatpush1.bf16.msra.mxu1 %v2584_v53  ;;  %3056 = vmatpush1.bf16.msra.mxu0 %v4925_v38  ;;  %v4951_v53 = vld [vmem:[#allocation2 + $0x944] ss:$8 sps:$4 sm:$0xff]  }
0x1279   :  { %2816 = vmatprep.subr.bf16.mxu1 %v4873_v21  ;;  %3057 = vmatprep.subr.bf16.mxu0 %v4930_v16  ;;  %v4946_v21 = vld [vmem:[#allocation2 + $0x930] ss:$8 sps:$4 sm:$0xff]  }
0x127b   :  { %4141 = vmatmul.mubr.msk.bf16.vlgmr.msra.gmra.mrb[44].mxu1 %vm128_vm3, %v5385_v55 }
0x127c   :  { %2631 = vmatprep.mubr.bf16.mxu1 %v5135_v12  ;;  %2817 = vmatpush1.bf16.msra.mxu1 %v4871_v24  ;;  %v4949_v24 = vld [vmem:[#allocation2 + $0x940] ss:$8 sps:$4 sm:$0xff]  }
0x127d   :  { %2818 = vmatprep.subr.bf16.mxu1 %v4876_v54  ;;  %3058 = vmatpush1.bf16.msra.mxu0 %v4928_v39  ;;  %v4954_v54 = vld [vmem:[#allocation2 + $0x954] ss:$8 sps:$4 sm:$0xff]  }
0x127e   :  { %3059 = vmatprep.subr.bf16.mxu0 %v4933_v41 }
0x1280   :  { %2819 = vmatpush1.bf16.msra.mxu1 %v4874_v56  ;;  %v4952_v56 = vld [vmem:[#allocation2 + $0x950] ss:$8 sps:$4 sm:$0xff]  }
0x1281   :  { %2820 = vmatprep.subr.bf16.mxu1 %v4879_v57  ;;  %3060 = vmatpush1.bf16.msra.mxu0 %v4931_v42  ;;  %v4957_v57 = vld [vmem:[#allocation2 + $0x964] ss:$8 sps:$4 sm:$0xff]  }
0x1282   :  { %3061 = vmatprep.subr.bf16.mxu0 %v4936_v9 }
0x1283   :  { %4142 = vmatmul.mubr.msk.bf16.gmra.mrb[48].mxu1 %vm128_vm3, %v5390_v60 }
0x1284   :  { %2821 = vmatpush1.bf16.msra.mxu1 %v4877_v58  ;;  %v4955_v58 = vld [vmem:[#allocation2 + $0x960] ss:$8 sps:$4 sm:$0xff]  }
0x1285   :  { %2822 = vmatprep.subr.bf16.mxu1 %v4882_v59  ;;  %3062 = vmatpush1.bf16.msra.mxu0 %v4934_v43  ;;  %v4960_v59 = vld [vmem:[#allocation2 + $0x974] ss:$8 sps:$4 sm:$0xff]  }
0x1286   :  { %3063 = vmatprep.subr.bf16.mxu0 %v4939_v44 }
0x1288   :  { %2823 = vmatpush1.bf16.msra.mxu1 %v4880_v61  ;;  %v4958_v61 = vld [vmem:[#allocation2 + $0x970] ss:$8 sps:$4 sm:$0xff]  }
0x1289   :  { %2824 = vmatprep.subr.bf16.mxu1 %v4885_v63  ;;  %3064 = vmatpush1.bf16.msra.mxu0 %v4937_v45 }
0x128a   :  { %3065 = vmatprep.subr.bf16.mxu0 %v4942_v47 }
0x128c   :  { %2825 = vmatpush1.bf16.msra.mxu1 %v4883_v0 }
0x128d   :  { %2826 = vmatprep.subr.bf16.mxu1 %v4888_v1  ;;  %3066 = vmatpush1.bf16.msra.mxu0 %v4940_v48 }
0x128e   :  { %3067 = vmatprep.subr.bf16.mxu0 %v4945_v49 }
0x1290   :  { %2827 = vmatpush1.bf16.msra.mxu1 %v4886_v11 }
0x1291   :  { %2828 = vmatprep.subr.bf16.mxu1 %v4891_v6  ;;  %3068 = vmatpush1.bf16.msra.mxu0 %v4943_v19 }
0x1292   :  { %3069 = vmatprep.subr.bf16.mxu0 %v4948_v52 }
0x1294   :  { %2829 = vmatpush1.bf16.msra.mxu1 %v4889_v2 }
0x1295   :  { %2830 = vmatprep.subr.bf16.mxu1 %v4894_v3  ;;  %3070 = vmatpush1.bf16.msra.mxu0 %v4946_v21 }
0x1296   :  { %3071 = vmatprep.subr.bf16.mxu0 %v4951_v53 }
0x1298   :  { %2831 = vmatpush1.bf16.msra.mxu1 %v4892_v40 }
0x1299   :  { %2832 = vmatprep.subr.bf16.mxu1 %v4897_v18  ;;  %3072 = vmatpush1.bf16.msra.mxu0 %v4949_v24 }
0x129a   :  { %3073 = vmatprep.subr.bf16.mxu0 %v4954_v54 }
0x129c   :  { %2833 = vmatpush1.bf16.msra.mxu1 %v4895_v20 }
0x129d   :  { %2834 = vmatprep.subr.bf16.mxu1 %v4900_v22  ;;  %3074 = vmatpush1.bf16.msra.mxu0 %v4952_v56 }
0x129e   :  { %3075 = vmatprep.subr.bf16.mxu0 %v4957_v57 }
0x12a0   :  { %2835 = vmatpush1.bf16.msra.mxu1 %v4898_v23 }
0x12a1   :  { %2836 = vmatprep.subr.bf16.mxu1 %v4903_v25  ;;  %3076 = vmatpush1.bf16.msra.mxu0 %v4955_v58  ;;  %v4963_v25 = vld [vmem:[#allocation2 + $0x984] ss:$8 sps:$4 sm:$0xff]  }
0x12a2   :  { %3077 = vmatprep.subr.bf16.mxu0 %v4960_v59  ;;  %v2578_v58 = vld [vmem:[#allocation2 + $0x9a0] sm:$0x11] }
0x12a3   :  { %v2881_v59 = vunpack.c.l.bf16 %v2578_v58 }
0x12a4   :  { %2837 = vmatpush1.bf16.msra.mxu1 %v4901_v26  ;;  %v4961_v26 = vld [vmem:[#allocation2 + $0x980] ss:$8 sps:$4 sm:$0xff]  }
0x12a5   :  { %2838 = vmatprep.subr.bf16.mxu1 %v4906_v13  ;;  %3078 = vmatpush1.bf16.msra.mxu0 %v4958_v61  ;;  %v4966_v13 = vld [vmem:[#allocation2 + $0x994] ss:$8 sps:$4 sm:$0xff]   ;;  %v2882_v61 = vunpack.c.h.bf16 %v2578_v58 }
0x12a6   :  { %3079 = vmatprep.subr.bf16.mxu0 %v4963_v25  ;;  %v4999_v58 = vld [vmem:[#allocation2 + $0xa54] ss:$8 sps:$4 sm:$0xff]  }
0x12a8   :  { %2839 = vmatpush1.bf16.msra.mxu1 %v4904_v27  ;;  %v4964_v27 = vld [vmem:[#allocation2 + $0x990] ss:$8 sps:$4 sm:$0xff]  }
0x12a9   :  { %2840 = vmatprep.subr.bf16.mxu1 %v4909_v28  ;;  %3080 = vmatpush1.bf16.msra.mxu0 %v4961_v26  ;;  %v2545_v28 = vld [vmem:[#allocation2 + $0x890] sm:$0x11] }
0x12aa   :  { %3081 = vmatprep.subr.bf16.mxu0 %v4966_v13 }
0x12ac   :  { %2841 = vmatpush1.bf16.msra.mxu1 %v4907_v29  ;;  %v2646_v29 = vunpack.c.l.bf16 %v2545_v28 }
0x12ad   :  { %2842 = vmatprep.subr.bf16.mxu1 %v4912_v30  ;;  %3082 = vmatpush1.bf16.msra.mxu0 %v4964_v27  ;;  %v2647_v30 = vunpack.c.h.bf16 %v2545_v28 }
0x12b0   :  { %2843 = vmatpush1.bf16.msra.mxu1 %v4910_v5  ;;  %v2651_v5 = vrot.slane %v2646_v29, %v5192_v34 }
0x12b1   :  { %2844 = vmatprep.subr.bf16.mxu1 %v4915_v4  ;;  %v2655_v4 = vrot.slane %v2647_v30, %v5192_v34 }
0x12b4   :  { %2845 = vmatpush1.bf16.msra.mxu1 %v4913_v8 }
0x12b5   :  { %2846 = vmatprep.subr.bf16.mxu1 %v4918_v32 }
0x12b8   :  { %2847 = vmatpush1.bf16.msra.mxu1 %v4916_v35 }
0x134e   :  { %v2623_v63 = vpop.f32.mrb[44].mxu1 }
0x134f   :  { %v2625_v0 = vpop.f32.mrb[45].mxu1 }
0x1350   :  { %v2627_v1 = vpop.f32.mrb[46].mxu1 }
0x1351   :  { %v2642_v11 = vpack.c.bf16 %v2627_v1, %v2623_v63  ;;  %v2629_v6 = vpop.f32.mrb[47].mxu1  ;;  %v2886_v63 = vrot.slane %v2881_v59, %v5192_v34  ;;  %v4997_v59 = vld [vmem:[#allocation2 + $0xa50] ss:$8 sps:$4 sm:$0xff]  }
0x1352   :  { %v2643_v2 = vpack.c.bf16 %v2629_v6, %v2625_v0  ;;  %v2890_v0 = vrot.slane %v2882_v61, %v5192_v34  ;;  %v5002_v61 = vld [vmem:[#allocation2 + $0xa64] ss:$8 sps:$4 sm:$0xff]  }
0x1354   :  { %2848 = vmatprep.mubr.bf16.mxu1 %v2643_v2 }
0x1355   :  { %2849 = vmatmul.mubr.bf16.vlgmr.msra.gmra.mrb[52].mxu1 %v2642_v11 }
0x1356   :  { %v2633_v3 = vpop.f32.mrb[48].mxu1 }
0x1357   :  { %v2635_v40 = vpop.f32.mrb[49].mxu1 }
0x1358   :  { %v2637_v18 = vpop.f32.mrb[50].mxu1 }
0x1359   :  { %v2644_v20 = vpack.c.bf16 %v2637_v18, %v2633_v3  ;;  %v2639_v22 = vpop.f32.mrb[51].mxu1 }
0x135a   :  { %v2645_v23 = vpack.c.bf16 %v2639_v22, %v2635_v40 }
0x135c   :  { %2858 = vmatprep.mubr.bf16.mxu1 %v2645_v23 }
0x135d   :  { %2859 = vmatmul.mubr.bf16.gmra.mrb[56].mxu1 %v2644_v20 }
0x135e   :  { %3228 = vmatprep.mubr.bf16.mxu1 %v5135_v12 }
0x1428   :  { %v2850_v8 = vpop.f32.mrb[52].mxu1 }
0x1429   :  { %v2851_v32 = vadd.f32 %v2850_v8, %v2651_v5  ;;  %v2852_v35 = vpop.f32.mrb[53].mxu1 }
0x142a   :  { %v2853_v36 = vadd.f32 %v2852_v35, %v2655_v4  ;;  %v2854_v37 = vpop.f32.mrb[54].mxu1 }
0x142b   :  { %v2855_v14 = vadd.f32 %v2854_v37, %v2651_v5  ;;  %v2856_v10 = vpop.f32.mrb[55].mxu1  ;;  %v2869_v38 = vmax.f32 %v2851_v32, 0.0 }
0x142c   :  { %v2857_v15 = vadd.f32 %v2856_v10, %v2655_v4  ;;  %v2870_v39 = vmax.f32 %v2853_v36, 0.0 }
0x142d   :  { %v2871_v16 = vmax.f32 %v2855_v14, 0.0 }
0x142e   :  { %v2872_v41 = vmax.f32 %v2857_v15, 0.0 }
0x142f   :  { %v2877_v42 = vpack.c.bf16 %v2871_v16, %v2869_v38 }
0x1430   :  { %v2878_v9 = vpack.c.bf16 %v2872_v41, %v2870_v39  ;;  %v2860_v43 = vpop.f32.mrb[56].mxu1 }
0x1431   :  { %v2861_v44 = vadd.f32 %v2860_v43, %v2651_v5  ;;  %v2862_v45 = vpop.f32.mrb[57].mxu1 }
0x1432   :  { %v2863_v47 = vadd.f32 %v2862_v45, %v2655_v4  ;;  %v2864_v48 = vpop.f32.mrb[58].mxu1  ;;  %3083 = vmatprep.mubr.bf16.mxu0 %v2878_v9  ;;  %v4969_v9 = vld [vmem:[#allocation2 + $0x9b4] ss:$8 sps:$4 sm:$0xff]   ;;  %v4978_v45 = vld [vmem:[#allocation2 + $0x9e4] ss:$8 sps:$4 sm:$0xff]  }
0x1433   :  { %v2865_v49 = vadd.f32 %v2864_v48, %v2651_v5  ;;  %v2866_v19 = vpop.f32.mrb[59].mxu1  ;;  %3084 = vmatmul.mubr.bf16.vlgmr.msra.gmra.mrb[64].mxu0 %v2877_v42  ;;  %v2873_v21 = vmax.f32 %v2861_v44, 0.0  ;;  %v4973_v44 = vld [vmem:[#allocation2 + $0x9d0] ss:$8 sps:$4 sm:$0xff]   ;;  %v4981_v48 = vld [vmem:[#allocation2 + $0x9f4] ss:$8 sps:$4 sm:$0xff]  }
0x1434   :  { %v2867_v52 = vadd.f32 %v2866_v19, %v2655_v4  ;;  %v2874_v24 = vmax.f32 %v2863_v47, 0.0  ;;  %v4976_v47 = vld [vmem:[#allocation2 + $0x9e0] ss:$8 sps:$4 sm:$0xff]  }
0x1435   :  { %v2875_v53 = vmax.f32 %v2865_v49, 0.0  ;;  %v4979_v49 = vld [vmem:[#allocation2 + $0x9f0] ss:$8 sps:$4 sm:$0xff]   ;;  %v4982_v19 = vld [vmem:[#allocation2 + $0xa00] ss:$8 sps:$4 sm:$0xff]  }
0x1436   :  { %v2876_v54 = vmax.f32 %v2867_v52, 0.0  ;;  %v4987_v52 = vld [vmem:[#allocation2 + $0xa14] ss:$8 sps:$4 sm:$0xff]  }
0x1437   :  { %v2879_v56 = vpack.c.bf16 %v2875_v53, %v2873_v21  ;;  %v4985_v21 = vld [vmem:[#allocation2 + $0xa10] ss:$8 sps:$4 sm:$0xff]   ;;  %v4990_v53 = vld [vmem:[#allocation2 + $0xa24] ss:$8 sps:$4 sm:$0xff]  }
0x1438   :  { %v2880_v57 = vpack.c.bf16 %v2876_v54, %v2874_v24  ;;  %v4988_v24 = vld [vmem:[#allocation2 + $0xa20] ss:$8 sps:$4 sm:$0xff]   ;;  %v4991_v54 = vld [vmem:[#allocation2 + $0xa30] ss:$8 sps:$4 sm:$0xff]  }
0x143a   :  { %3093 = vmatprep.mubr.bf16.mxu0 %v2880_v57  ;;  %v4994_v57 = vld [vmem:[#allocation2 + $0xa40] ss:$8 sps:$4 sm:$0xff]  }
0x143b   :  { %3094 = vmatmul.mubr.bf16.gmra.mrb[68].mxu0 %v2879_v56  ;;  %v4996_v56 = vld [vmem:[#allocation2 + $0xa44] ss:$8 sps:$4 sm:$0xff]  }
0x1506   :  { %v3085_v1 = vpop.f32.mrb[64].mxu0 }
0x1507   :  { %v3086_v11 = vadd.f32 %v3085_v1, %v2886_v63  ;;  %v3087_v6 = vpop.f32.mrb[65].mxu0  ;;  %v5003_v1 = vld [vmem:[#allocation2 + $0xa70] ss:$8 sps:$4 sm:$0xff]  }
0x1508   :  { %v3088_v2 = vadd.f32 %v3087_v6, %v2890_v0  ;;  %v3089_v3 = vpop.f32.mrb[66].mxu0  ;;  %v5006_v6 = vld [vmem:[#allocation2 + $0xa80] ss:$8 sps:$4 sm:$0xff]  }
0x1509   :  { %v3090_v40 = vadd.f32 %v3089_v3, %v2886_v63  ;;  %v3091_v18 = vpop.f32.mrb[67].mxu0  ;;  %v3104_v23 = vmax.f32 %v3086_v11, 0.0  ;;  %v5008_v11 = vld [vmem:[#allocation2 + $0xa84] ss:$8 sps:$4 sm:$0xff]   ;;  %v5009_v3 = vld [vmem:[#allocation2 + $0xa90] ss:$8 sps:$4 sm:$0xff]  }
0x150a   :  { %v3105_v20 = vmax.f32 %v3088_v2, 0.0  ;;  %v3092_v22 = vadd.f32 %v3091_v18, %v2890_v0  ;;  %v5011_v2 = vld [vmem:[#allocation2 + $0xa94] ss:$8 sps:$4 sm:$0xff]   ;;  %v5012_v18 = vld [vmem:[#allocation2 + $0xaa0] ss:$8 sps:$4 sm:$0xff]  }
0x150b   :  { %v3106_v25 = vmax.f32 %v3090_v40, 0.0  ;;  %v5409_v30 = vadd.f32 %v3104_v23, %v5354_v7  ;;  %v5014_v40 = vld [vmem:[#allocation2 + $0xaa4] ss:$8 sps:$4 sm:$0xff]   ;;  %v5020_v23 = vld [vmem:[#allocation2 + $0xad4] ss:$8 sps:$4 sm:$0xff]  }
0x150c   :  { %v3107_v26 = vmax.f32 %v3092_v22, 0.0  ;;  %v5403_v27 = vadd.f32 %v3105_v20, %v5357_v31  ;;  %v5015_v20 = vld [vmem:[#allocation2 + $0xac0] ss:$8 sps:$4 sm:$0xff]   ;;  %v5017_v22 = vld [vmem:[#allocation2 + $0xac4] ss:$8 sps:$4 sm:$0xff]  }
0x150d   :  { %v5400_v13 = vadd.f32 %v3106_v25, %v5359_v33  ;;  %3658 = vmatprep.subr.bf16.mxu0 %v5017_v22  ;;  %v5018_v25 = vld [vmem:[#allocation2 + $0xad0] ss:$8 sps:$4 sm:$0xff]  }
0x150e   :  { %v5406_v28 = vadd.f32 %v3107_v26, %v5361_v62  ;;  %v3095_v29 = vpop.f32.mrb[68].mxu0  ;;  %3659 = vmatpush1.bf16.msra.mxu0 %v5015_v20  ;;  %v5023_v26 = vld [vmem:[#allocation2 + $0xae4] ss:$8 sps:$4 sm:$0xff]  }
0x150f   :  { %v3096_v5 = vadd.f32 %v3095_v29, %v2886_v63  ;;  %v3097_v4 = vpop.f32.mrb[69].mxu0  ;;  %v3186_v33 = vpack.c.bf16 %v5400_v13, %v5409_v30  ;;  %3660 = vmatprep.subr.bf16.mxu0 %v5020_v23  ;;  %v5021_v29 = vld [vmem:[#allocation2 + $0xae0] ss:$8 sps:$4 sm:$0xff]  }
0x1510   :  { %v3098_v8 = vadd.f32 %v3097_v4, %v2890_v0  ;;  %v3099_v32 = vpop.f32.mrb[70].mxu0  ;;  %v3187_v35 = vpack.c.bf16 %v5406_v28, %v5403_v27  ;;  %v5024_v4 = vld [vmem:[#allocation2 + $0xaf0] ss:$8 sps:$4 sm:$0xff]  }
0x1511   :  { %v3108_v36 = vmax.f32 %v3096_v5, 0.0  ;;  %v3100_v31 = vadd.f32 %v3099_v32, %v2886_v63  ;;  %v3101_v37 = vpop.f32.mrb[71].mxu0  ;;  %v5000_v63 = vld [vmem:[#allocation2 + $0xa60] ss:$8 sps:$4 sm:$0xff]   ;;  %v5026_v5 = vld [vmem:[#allocation2 + $0xaf4] ss:$8 sps:$4 sm:$0xff]  }
0x1512   :  { %v3109_v14 = vmax.f32 %v3098_v8, 0.0  ;;  %v3102_v62 = vadd.f32 %v3101_v37, %v2890_v0  ;;  %3196 = vmatprep.subr.bf16.mxu1 %v3187_v35  ;;  %v5005_v0 = vld [vmem:[#allocation2 + $0xa74] ss:$8 sps:$4 sm:$0xff]   ;;  %3661 = vmatpush1.bf16.msra.mxu0 %v5018_v25  ;;  %v5029_v8 = vld [vmem:[#allocation2 + $0xb04] ss:$8 sps:$4 sm:$0xff]  }
0x1513   :  { %v3110_v10 = vmax.f32 %v3100_v31, 0.0  ;;  %3197 = vmatpush1.bf16.msra.mxu1 %v3186_v33  ;;  %v5416_v15 = vadd.f32 %v3108_v36, %v5370_v46  ;;  %v4967_v46 = vld [vmem:[#allocation2 + $0x9b0] ss:$8 sps:$4 sm:$0xff]   ;;  %3662 = vmatprep.subr.bf16.mxu0 %v5023_v26  ;;  %v5027_v32 = vld [vmem:[#allocation2 + $0xb00] ss:$8 sps:$4 sm:$0xff]  }
0x1514   :  { %v3111_v7 = vmax.f32 %v3102_v62, 0.0  ;;  %v5422_v16 = vadd.f32 %v3109_v14, %v5373_v17  ;;  %v4970_v17 = vld [vmem:[#allocation2 + $0x9c0] ss:$8 sps:$4 sm:$0xff]   ;;  %v5032_v35 = vld [vmem:[#allocation2 + $0xb14] ss:$8 sps:$4 sm:$0xff]  }
0x1515   :  { %v5419_v38 = vadd.f32 %v3110_v10, %v5375_v50  ;;  %v4972_v50 = vld [vmem:[#allocation2 + $0x9c4] ss:$8 sps:$4 sm:$0xff]   ;;  %v5030_v33 = vld [vmem:[#allocation2 + $0xb10] ss:$8 sps:$4 sm:$0xff]   ;;  %v5033_v31 = vld [vmem:[#allocation2 + $0xb20] ss:$8 sps:$4 sm:$0xff]  }
0x1516   :  { %v5425_v39 = vadd.f32 %v3111_v7, %v5377_v51  ;;  %v4975_v51 = vld [vmem:[#allocation2 + $0x9d4] ss:$8 sps:$4 sm:$0xff]   ;;  %3663 = vmatpush1.bf16.msra.mxu0 %v5021_v29  ;;  %v5035_v36 = vld [vmem:[#allocation2 + $0xb24] ss:$8 sps:$4 sm:$0xff]   ;;  %v5036_v14 = vld [vmem:[#allocation2 + $0xb30] ss:$8 sps:$4 sm:$0xff]  }
0x1517   :  { %v3188_v41 = vpack.c.bf16 %v5419_v38, %v5416_v15  ;;  %3664 = vmatprep.subr.bf16.mxu0 %v5026_v5  ;;  %v5038_v37 = vld [vmem:[#allocation2 + $0xb34] ss:$8 sps:$4 sm:$0xff]   ;;  %v5041_v62 = vld [vmem:[#allocation2 + $0xb44] ss:$8 sps:$4 sm:$0xff]   ;;  %v5039_v10 = vld [vmem:[#allocation2 + $0xb40] ss:$8 sps:$4 sm:$0xff]  }
0x1518   :  { %v3189_v42 = vpack.c.bf16 %v5425_v39, %v5422_v16  ;;  %v5044_v7 = vld [vmem:[#allocation2 + $0xb54] ss:$8 sps:$4 sm:$0xff]  }
0x1519   :  { %v3191_v43 = vsel %vm135_vm2, %v3188_v41, 0  ;;  %v5042_v41 = vld [vmem:[#allocation2 + $0xb50] ss:$8 sps:$4 sm:$0xff]  }
0x151a   :  { %4207 = vmatprep.subr.msk.bf16.mxu1 %vm135_vm2, %v3189_v42  ;;  %3665 = vmatpush1.bf16.msra.mxu0 %v5024_v4  ;;  %v5047_v42 = vld [vmem:[#allocation2 + $0xb64] ss:$8 sps:$4 sm:$0xff]  }
0x151b   :  { %3199 = vmatpush1.bf16.msra.mxu1 %v3191_v43  ;;  %3666 = vmatprep.subr.bf16.mxu0 %v5029_v8  ;;  %v5050_v43 = vld [vmem:[#allocation2 + $0xb74] ss:$8 sps:$4 sm:$0xff]  }
0x151c   :  { %3423 = vmatprep.subr.bf16.mxu1 %v4969_v9  ;;  %v5045_v9 = vld [vmem:[#allocation2 + $0xb60] ss:$8 sps:$4 sm:$0xff]  }
0x151e   :  { %4208 = vmatmul.mubr.msk.bf16.vlgmr.msra.gmra.mrb[60].mxu1 %vm128_vm3, %v5385_v55  ;;  %v4984_v55 = vld [vmem:[#allocation2 + $0xa04] ss:$8 sps:$4 sm:$0xff]   ;;  %3667 = vmatpush1.bf16.msra.mxu0 %v5027_v32 }
0x151f   :  { %3238 = vmatprep.mubr.bf16.mxu1 %v5135_v12  ;;  %3424 = vmatpush1.bf16.msra.mxu1 %v4967_v46  ;;  %v5048_v46 = vld [vmem:[#allocation2 + $0xb70] ss:$8 sps:$4 sm:$0xff]  }
0x1520   :  { %3425 = vmatprep.subr.bf16.mxu1 %v4972_v50  ;;  %3668 = vmatprep.subr.bf16.mxu0 %v5032_v35  ;;  %v5053_v50 = vld [vmem:[#allocation2 + $0xb84] ss:$8 sps:$4 sm:$0xff]  }
0x1522   :  { %3669 = vmatpush1.bf16.msra.mxu0 %v5030_v33 }
0x1523   :  { %3426 = vmatpush1.bf16.msra.mxu1 %v4970_v17  ;;  %3670 = vmatprep.subr.bf16.mxu0 %v5035_v36  ;;  %v5051_v17 = vld [vmem:[#allocation2 + $0xb80] ss:$8 sps:$4 sm:$0xff]  }
0x1524   :  { %3427 = vmatprep.subr.bf16.mxu1 %v4975_v51  ;;  %v5056_v51 = vld [vmem:[#allocation2 + $0xb94] ss:$8 sps:$4 sm:$0xff]  }
0x1526   :  { %4209 = vmatmul.mubr.msk.bf16.gmra.mrb[64].mxu1 %vm128_vm3, %v5390_v60  ;;  %v4993_v60 = vld [vmem:[#allocation2 + $0xa34] ss:$8 sps:$4 sm:$0xff]   ;;  %3671 = vmatpush1.bf16.msra.mxu0 %v5033_v31 }
0x1527   :  { %3428 = vmatpush1.bf16.msra.mxu1 %v4973_v44  ;;  %3672 = vmatprep.subr.bf16.mxu0 %v5038_v37  ;;  %v5054_v44 = vld [vmem:[#allocation2 + $0xb90] ss:$8 sps:$4 sm:$0xff]  }
0x1528   :  { %3429 = vmatprep.subr.bf16.mxu1 %v4978_v45 }
0x152a   :  { %3673 = vmatpush1.bf16.msra.mxu0 %v5036_v14 }
0x152b   :  { %3430 = vmatpush1.bf16.msra.mxu1 %v4976_v47  ;;  %3674 = vmatprep.subr.bf16.mxu0 %v5041_v62 }
0x152c   :  { %3431 = vmatprep.subr.bf16.mxu1 %v4981_v48 }
0x152e   :  { %3675 = vmatpush1.bf16.msra.mxu0 %v5039_v10 }
0x152f   :  { %3432 = vmatpush1.bf16.msra.mxu1 %v4979_v49  ;;  %3676 = vmatprep.subr.bf16.mxu0 %v5044_v7 }
0x1530   :  { %3433 = vmatprep.subr.bf16.mxu1 %v4984_v55 }
0x1532   :  { %3677 = vmatpush1.bf16.msra.mxu0 %v5042_v41 }
0x1533   :  { %3434 = vmatpush1.bf16.msra.mxu1 %v4982_v19  ;;  %3678 = vmatprep.subr.bf16.mxu0 %v5047_v42 }
0x1534   :  { %3435 = vmatprep.subr.bf16.mxu1 %v4987_v52 }
0x1536   :  { %3679 = vmatpush1.bf16.msra.mxu0 %v5045_v9 }
0x1537   :  { %3436 = vmatpush1.bf16.msra.mxu1 %v4985_v21  ;;  %3680 = vmatprep.subr.bf16.mxu0 %v5050_v43 }
0x1538   :  { %3437 = vmatprep.subr.bf16.mxu1 %v4990_v53 }
0x153a   :  { %3681 = vmatpush1.bf16.msra.mxu0 %v5048_v46  ;;  %v5063_v46 = vld [vmem:[#allocation2 + $0xc60] ss:$8 sps:$4 sm:$0xff]  }
0x153b   :  { %3438 = vmatpush1.bf16.msra.mxu1 %v4988_v24  ;;  %3682 = vmatprep.subr.bf16.mxu0 %v5053_v50  ;;  %v5064_v50 = vld [vmem:[#allocation2 + $0xbe0] ss:$8 sps:$4 sm:$0xff]  }
0x153c   :  { %3439 = vmatprep.subr.bf16.mxu1 %v4993_v60 }
0x153e   :  { %3683 = vmatpush1.bf16.msra.mxu0 %v5051_v17  ;;  %v5065_v17 = vld [vmem:[#allocation2 + $0xc70] ss:$8 sps:$4 sm:$0xff]  }
0x153f   :  { %3440 = vmatpush1.bf16.msra.mxu1 %v4991_v54  ;;  %3684 = vmatprep.subr.bf16.mxu0 %v5056_v51  ;;  %v5066_v51 = vld [vmem:[#allocation2 + $0xbf0] ss:$8 sps:$4 sm:$0xff]  }
0x1540   :  { %3441 = vmatprep.subr.bf16.mxu1 %v4996_v56  ;;  %v5059_v56 = vld [vmem:[#allocation2 + $0xba4] ss:$8 sps:$4 sm:$0xff]  }
0x1542   :  { %3685 = vmatpush1.bf16.msra.mxu0 %v5054_v44  ;;  %v5067_v44 = vld [vmem:[#allocation2 + $0xc80] ss:$8 sps:$4 sm:$0xff]  }
0x1543   :  { %3442 = vmatpush1.bf16.msra.mxu1 %v4994_v57  ;;  %v5057_v57 = vld [vmem:[#allocation2 + $0xba0] ss:$8 sps:$4 sm:$0xff]   ;;  %3686 = vmatprep.subr.bf16.mxu0 %v5059_v56 }
0x1544   :  { %3443 = vmatprep.subr.bf16.mxu1 %v4999_v58  ;;  %v5062_v58 = vld [vmem:[#allocation2 + $0xbb4] ss:$8 sps:$4 sm:$0xff]  }
0x1546   :  { %3687 = vmatpush1.bf16.msra.mxu0 %v5057_v57 }
0x1547   :  { %3444 = vmatpush1.bf16.msra.mxu1 %v4997_v59  ;;  %v5060_v59 = vld [vmem:[#allocation2 + $0xbb0] ss:$8 sps:$4 sm:$0xff]   ;;  %3688 = vmatprep.subr.bf16.mxu0 %v5062_v58 }
0x1548   :  { %3445 = vmatprep.subr.bf16.mxu1 %v5002_v61  ;;  %v3152_v61 = vld [vmem:[#allocation2 + $0xab0] sm:$0x11] }
0x154a   :  { %3689 = vmatpush1.bf16.msra.mxu0 %v5060_v59 }
0x154b   :  { %3446 = vmatpush1.bf16.msra.mxu1 %v5000_v63  ;;  %v3253_v63 = vunpack.c.l.bf16 %v3152_v61 }
0x154c   :  { %3447 = vmatprep.subr.bf16.mxu1 %v5005_v0  ;;  %v3254_v0 = vunpack.c.h.bf16 %v3152_v61 }
0x154f   :  { %3448 = vmatpush1.bf16.msra.mxu1 %v5003_v1  ;;  %v3258_v1 = vrot.slane %v3253_v63, %v5192_v34 }
0x1550   :  { %3449 = vmatprep.subr.bf16.mxu1 %v5008_v11  ;;  %v3262_v11 = vrot.slane %v3254_v0, %v5192_v34 }
0x1553   :  { %3450 = vmatpush1.bf16.msra.mxu1 %v5006_v6 }
0x1554   :  { %3451 = vmatprep.subr.bf16.mxu1 %v5011_v2 }
0x1557   :  { %3452 = vmatpush1.bf16.msra.mxu1 %v5009_v3 }
0x1558   :  { %3453 = vmatprep.subr.bf16.mxu1 %v5014_v40 }
0x155b   :  { %3454 = vmatpush1.bf16.msra.mxu1 %v5012_v18 }
0x155c   :  { %4418 = vmatprep.subr.bf16.mxu1 %v5063_v46 }
0x15f1   :  { %v3230_v45 = vpop.f32.mrb[60].mxu1 }
0x15f2   :  { %v3232_v47 = vpop.f32.mrb[61].mxu1 }
0x15f3   :  { %v3234_v48 = vpop.f32.mrb[62].mxu1 }
0x15f4   :  { %v3249_v49 = vpack.c.bf16 %v3234_v48, %v3230_v45  ;;  %v3236_v55 = vpop.f32.mrb[63].mxu1  ;;  %v5068_v45 = vld [vmem:[#allocation2 + $0xc00] ss:$8 sps:$4 sm:$0xff]   ;;  %v5070_v48 = vld [vmem:[#allocation2 + $0xc10] ss:$8 sps:$4 sm:$0xff]  }
0x15f5   :  { %v3250_v19 = vpack.c.bf16 %v3236_v55, %v3232_v47  ;;  %v5069_v47 = vld [vmem:[#allocation2 + $0xc90] ss:$8 sps:$4 sm:$0xff]   ;;  %v5072_v55 = vld [vmem:[#allocation2 + $0xc20] ss:$8 sps:$4 sm:$0xff]  }
0x15f7   :  { %3455 = vmatprep.mubr.bf16.mxu1 %v3250_v19  ;;  %v5074_v19 = vld [vmem:[#allocation2 + $0xc30] ss:$8 sps:$4 sm:$0xff]  }
0x15f8   :  { %3456 = vmatmul.mubr.bf16.vlgmr.msra.gmra.mrb[68].mxu1 %v3249_v49  ;;  %v5071_v49 = vld [vmem:[#allocation2 + $0xca0] ss:$8 sps:$4 sm:$0xff]  }
0x15f9   :  { %v3240_v52 = vpop.f32.mrb[64].mxu1  ;;  %4419 = vmatpush3.bf16.msra.mxu1 %v5064_v50 }
0x15fa   :  { %v3242_v21 = vpop.f32.mrb[65].mxu1  ;;  %4420 = vmatprep.subr.bf16.mxu1 %v5065_v17  ;;  %v3760_v17 = vld [vmem:[#allocation2 + $0xce0] sm:$0x1] }
0x15fb   :  { %v3244_v53 = vpop.f32.mrb[66].mxu1 }
0x15fc   :  { %v3251_v24 = vpack.c.bf16 %v3244_v53, %v3240_v52  ;;  %v3246_v60 = vpop.f32.mrb[67].mxu1  ;;  %v5075_v52 = vld [vmem:[#allocation2 + $0xcc0] ss:$8 sps:$4 sm:$0xff]  }
0x15fd   :  { %v3252_v54 = vpack.c.bf16 %v3246_v60, %v3242_v21  ;;  %4421 = vmatpush3.bf16.msra.mxu1 %v5066_v51  ;;  %v5076_v21 = vld [vmem:[#allocation2 + $0xc40] ss:$8 sps:$4 sm:$0xff]   ;;  %v3817_v51 = vunpack.c.l.bf16 %v3760_v17 }
0x15fe   :  { %4422 = vmatprep.subr.bf16.mxu1 %v5067_v44  ;;  %v3185_v53 = vld [vmem:[#allocation2 + $0xbc0] sm:$0x11] }
0x15ff   :  { %3465 = vmatprep.mubr.bf16.mxu1 %v3252_v54  ;;  %v3489_v60 = vunpack.c.h.bf16 %v3185_v53 }
0x1600   :  { %3466 = vmatmul.mubr.bf16.gmra.mrb[72].mxu1 %v3251_v24  ;;  %v3488_v24 = vunpack.c.l.bf16 %v3185_v53 }
0x1601   :  { %4423 = vmatpush3.bf16.msra.mxu1 %v5068_v45  ;;  %v3497_v56 = vrot.slane %v3489_v60, %v5192_v34  ;;  %v3821_v45 = vrot.slane %v3817_v51, %v5192_v34 }
0x1602   :  { %4424 = vmatprep.subr.bf16.mxu1 %v5069_v47  ;;  %v3493_v54 = vrot.slane %v3488_v24, %v5192_v34 }
0x1605   :  { %4425 = vmatpush3.bf16.msra.mxu1 %v5070_v48 }
0x1606   :  { %4426 = vmatprep.subr.bf16.mxu1 %v5071_v49 }
0x1609   :  { %4427 = vmatpush3.bf16.msra.mxu1 %v5072_v55 }
0x16cb   :  { %v3457_v6 = vpop.f32.mrb[68].mxu1 }
0x16cc   :  { %v3458_v2 = vadd.f32 %v3457_v6, %v3258_v1  ;;  %v3459_v3 = vpop.f32.mrb[69].mxu1 }
0x16cd   :  { %v3460_v40 = vadd.f32 %v3459_v3, %v3262_v11  ;;  %v3461_v18 = vpop.f32.mrb[70].mxu1 }
0x16ce   :  { %v3462_v20 = vadd.f32 %v3461_v18, %v3258_v1  ;;  %v3463_v22 = vpop.f32.mrb[71].mxu1  ;;  %v3476_v25 = vmax.f32 %v3458_v2, 0.0 }
0x16cf   :  { %v3464_v23 = vadd.f32 %v3463_v22, %v3262_v11  ;;  %v3477_v29 = vmax.f32 %v3460_v40, 0.0 }
0x16d0   :  { %v3478_v26 = vmax.f32 %v3462_v20, 0.0 }
0x16d1   :  { %v3479_v5 = vmax.f32 %v3464_v23, 0.0 }
0x16d2   :  { %v3484_v4 = vpack.c.bf16 %v3478_v26, %v3476_v25 }
0x16d3   :  { %v3485_v8 = vpack.c.bf16 %v3479_v5, %v3477_v29  ;;  %v3467_v32 = vpop.f32.mrb[72].mxu1 }
0x16d4   :  { %v3468_v35 = vadd.f32 %v3467_v32, %v3258_v1  ;;  %v3469_v33 = vpop.f32.mrb[73].mxu1 }
0x16d5   :  { %v3470_v36 = vadd.f32 %v3469_v33, %v3262_v11  ;;  %v3471_v31 = vpop.f32.mrb[74].mxu1  ;;  %3690 = vmatprep.mubr.bf16.mxu0 %v3485_v8 }
0x16d6   :  { %v3472_v37 = vadd.f32 %v3471_v31, %v3258_v1  ;;  %v3473_v14 = vpop.f32.mrb[75].mxu1  ;;  %3691 = vmatmul.mubr.bf16.vlgmr.msra.gmra.mrb[72].mxu0 %v3484_v4  ;;  %v3480_v10 = vmax.f32 %v3468_v35, 0.0 }
0x16d7   :  { %v3474_v62 = vadd.f32 %v3473_v14, %v3262_v11  ;;  %v3481_v41 = vmax.f32 %v3470_v36, 0.0 }
0x16d8   :  { %v3482_v7 = vmax.f32 %v3472_v37, 0.0 }
0x16d9   :  { %v3483_v42 = vmax.f32 %v3474_v62, 0.0 }
0x16da   :  { %v3486_v9 = vpack.c.bf16 %v3482_v7, %v3480_v10 }
0x16db   :  { %v3487_v43 = vpack.c.bf16 %v3483_v42, %v3481_v41  ;;  %v3727_v42 = vld [vmem:[#allocation2 + $0xbd0] sm:$0x1] }
0x16dd   :  { %3700 = vmatprep.mubr.bf16.mxu0 %v3487_v43  ;;  %v5078_v43 = vld [vmem:[#allocation2 + $0xc50] ss:$8 sps:$4 sm:$0xff]  }
0x16de   :  { %3701 = vmatmul.mubr.bf16.gmra.mrb[76].mxu0 %v3486_v9  ;;  %v5077_v9 = vld [vmem:[#allocation2 + $0xcd0] ss:$8 sps:$4 sm:$0xff]  }
0x16df   :  { %3806 = vmatprep.mubr.bf16.mxu0 %v5135_v12  ;;  %v5073_v12 = vld [vmem:[#allocation2 + $0xcb0] ss:$8 sps:$4 sm:$0xff]  }
0x16e0   :  { %4428 = vmatprep.subr.bf16.mxu1 %v5073_v12 }
0x16e1   :  { %4429 = vmatpush3.bf16.msra.mxu1 %v5074_v19 }
0x16e2   :  { %4430 = vmatprep.subr.bf16.mxu1 %v5075_v52 }
0x16e5   :  { %4431 = vmatpush3.bf16.msra.mxu1 %v5076_v21 }
0x16e6   :  { %4432 = vmatprep.subr.bf16.mxu1 %v5077_v9 }
0x16e9   :  { %4433 = vmatpush3.bf16.msra.mxu1 %v5078_v43 }
0x17a9   :  { %v3692_v57 = vpop.f32.mrb[72].mxu0 }
0x17aa   :  { %v3693_v58 = vadd.f32 %v3692_v57, %v3493_v54  ;;  %v3694_v59 = vpop.f32.mrb[73].mxu0 }
0x17ab   :  { %v3695_v61 = vadd.f32 %v3694_v59, %v3497_v56  ;;  %v3696_v63 = vpop.f32.mrb[74].mxu0 }
0x17ac   :  { %v3711_v0 = vmax.f32 %v3693_v58, 0.0  ;;  %v3697_v1 = vadd.f32 %v3696_v63, %v3493_v54  ;;  %v3698_v11 = vpop.f32.mrb[75].mxu0 }
0x17ad   :  { %v3712_v6 = vmax.f32 %v3695_v61, 0.0  ;;  %v3699_v2 = vadd.f32 %v3698_v11, %v3497_v56 }
0x17ae   :  { %v3713_v3 = vmax.f32 %v3697_v1, 0.0  ;;  %v3719_v18 = vadd.f32 %v3711_v0, %v5409_v30 }
0x17af   :  { %v3714_v40 = vmax.f32 %v3699_v2, 0.0  ;;  %v3720_v22 = vadd.f32 %v3712_v6, %v5403_v27 }
0x17b0   :  { %v3721_v20 = vadd.f32 %v3713_v3, %v5400_v13 }
0x17b1   :  { %v3722_v23 = vadd.f32 %v3714_v40, %v5406_v28  ;;  %v3702_v25 = vpop.f32.mrb[76].mxu0 }
0x17b2   :  { %v3761_v26 = vpack.c.bf16 %v3721_v20, %v3719_v18  ;;  %v3703_v29 = vadd.f32 %v3702_v25, %v3493_v54  ;;  %v3704_v5 = vpop.f32.mrb[77].mxu0 }
0x17b3   :  { %v3705_v4 = vadd.f32 %v3704_v5, %v3497_v56  ;;  %v3706_v8 = vpop.f32.mrb[78].mxu0  ;;  %v3762_v32 = vpack.c.bf16 %v3722_v23, %v3720_v22 }
0x17b4   :  { %v3715_v35 = vmax.f32 %v3703_v29, 0.0  ;;  %v3707_v33 = vadd.f32 %v3706_v8, %v3493_v54  ;;  %v3708_v36 = vpop.f32.mrb[79].mxu0 }
0x17b5   :  { %v3716_v31 = vmax.f32 %v3705_v4, 0.0  ;;  %v3709_v37 = vadd.f32 %v3708_v36, %v3497_v56  ;;  %3774 = vmatprep.subr.bf16.mxu0 %v3762_v32 }
0x17b6   :  { %v3717_v30 = vmax.f32 %v3707_v33, 0.0  ;;  %3775 = vmatpush1.bf16.msra.mxu0 %v3761_v26  ;;  %v3723_v27 = vadd.f32 %v3715_v35, %v5416_v15 }
0x17b7   :  { %v3718_v13 = vmax.f32 %v3709_v37, 0.0  ;;  %v3724_v14 = vadd.f32 %v3716_v31, %v5422_v16 }
0x17b8   :  { %v3725_v28 = vadd.f32 %v3717_v30, %v5419_v38 }
0x17b9   :  { %v3726_v62 = vadd.f32 %v3718_v13, %v5425_v39 }
0x17ba   :  { %v3763_v10 = vpack.c.bf16 %v3725_v28, %v3723_v27 }
0x17bb   :  { %v3764_v7 = vpack.c.bf16 %v3726_v62, %v3724_v14 }
0x17bc   :  { %v3769_v41 = vsel %vm135_vm2, %v3763_v10, 0 }
0x17bd   :  { %4274 = vmatprep.subr.msk.bf16.mxu0 %vm135_vm2, %v3764_v7 }
0x17be   :  { %3777 = vmatpush1.bf16.msra.mxu0 %v3769_v41 }
0x17c1   :  { %4275 = vmatmul.mubr.msk.bf16.vlgmr.msra.gmra.mrb[80].mxu0 %vm128_vm3, %v3727_v42 }
0x1894   :  { %v3808_v15 = vpop.f32.mrb[80].mxu0 }
0x1895   :  { %v3810_v38 = vpop.f32.mrb[81].mxu0  ;;  %v3815_v50 = vpack.c.bf16 %v3808_v15, %v3808_v15 }
0x1896   :  { %v3816_v46 = vpack.c.bf16 %v3810_v38, %v3810_v38  ;;  %v3812_v16 = vpop.f32.mrb[82].mxu0 }
0x1897   :  { %v3813_v39 = vpop.f32.mrb[83].mxu0 }
0x1898   :  { %3950 = vmatprep.mubr.bf16.mxu1 %v3816_v46 }
0x1899   :  { %3951 = vmatmul.mubr.bf16.vlgmr.msra.gmra.mrb[76].mxu1 %v3815_v50 }
0x196c   :  { %v4434_v44 = vpop.f32.mrb[76].mxu1 }
0x196d   :  { %v4435_v47 = vpop.f32.mrb[77].mxu1 }
0x196e   :  { %v4436_v48 = vadd.f32 %v4435_v47, %v4434_v44  ;;  %v4437_v49 = vpop.f32.mrb[78].mxu1 }
0x196f   :  { %v4438_v55 = vpop.f32.mrb[79].mxu1 }
0x1970   :  { %v3953_v12 = vadd.f32 %v4436_v48, %v3821_v45 }
0x1972   :  { %3958 = vst [vmem:[#allocation5] sm:$0x3] %v3953_v12 }
0x1973   :  { %5116 = shalt.err (!%p5113_p12)
}
0x1974   :  { %s5117_s6 = scalar_lea.hbm %s5469_s2, 32 }
0x1975   :  { %p5118_p13 = scmp.ne.s32.totalorder %s5469_s2, %s5117_s6  ;;  %p5121_p0 = scmp.lt.u32.totalorder %s5117_s6, %s5469_s2 }
0x1977   :  { %p5123_p1 = pnand %p5121_p0, %p5118_p13 }
0x1979   :  { %5126 = shalt.err (!%p5123_p1)
}
0x197a   :  { %3968 = dma.vmem_to_hbm [thread:$0]  %s3966_s30, 32, %s5469_s2, [#allocation4]  }
0x197b   :  { %5129 = dma.done.wait [#allocation4], 32  }
0x197c   :  { %5130 = vsyncadd [#allocation4], 4294967264 }
0x197d   :  { %3972 = vsyncpa [#allocation3], 1 }
0x197e   :  { %3973 = vsyncpa [#allocation4], 1 }

</bundles_post_ra>
